<compile_context>
chip_gen: v6e
topology: v6e:2x2x1
jax: 0.10.0
libtpu: 0.0.40
codegen_flags: <defaults>
</compile_context>

<pallas_src>
import functools

import jax
import jax.numpy as jnp
from jax.experimental import pallas as pl
from jax.experimental.pallas import tpu as pltpu


_SQRT_2_OVER_PI = 0.7978845608028654


def _layer_norm(x, gamma, beta, eps=1e-5):
    mu = jnp.mean(x, axis=-1, keepdims=True)
    xc = x - mu
    var = jnp.mean(xc * xc, axis=-1, keepdims=True)
    return xc * jax.lax.rsqrt(var + eps) * gamma + beta


def _gelu(x):
    # tanh approximation of GELU (see TODO at top).
    return 0.5 * x * (1.0 + jnp.tanh(_SQRT_2_OVER_PI * (x + 0.044715 * x * x * x)))


def _encoder_kernel(
    x_ref,
    ln1_w_ref, ln1_b_ref,
    wqkv_ref, bqkv_ref,
    wo_ref, bo_ref,
    ln2_w_ref, ln2_b_ref,
    w1_ref, b1_ref,
    w2_ref, b2_ref,
    lnf_w_ref, lnf_b_ref,
    o_ref,
    *, num_heads,
):
    """One grid step = one (batch_tile, layer) pair.

    x_ref : (bt, S, E) input block, read only at layer == 0.
    o_ref : (bt, S, E) output block; doubles as the f32 residual carry — its
            index_map ignores the layer axis so it stays VMEM-resident across
            layers and is written back to HBM only after the last layer.
    """
    layer = pl.program_id(1)
    num_layers = pl.num_programs(1)

    bt, seq, embed = o_ref.shape
    tokens = bt * seq
    head_dim = embed // num_heads
    cdt = wqkv_ref.dtype                       # MXU operand dtype (bf16)

    @pl.when(layer == 0)
    def _():
        o_ref[...] = x_ref[...]

    # Residual stream, token-major: (bt*S, E) — full-width M for every matmul.
    x2d = o_ref[...].reshape(tokens, embed).astype(jnp.float32)

    # ---------------- Multi-head attention on LayerNorm_1(x) ----------------
    h = _layer_norm(x2d, ln1_w_ref[0, 0], ln1_b_ref[0, 0]).astype(cdt)
    qkv = jnp.dot(h, wqkv_ref[0], preferred_element_type=jnp.float32)
    qkv = qkv + bqkv_ref[0]                    # (tokens, 3E); 1/sqrt(E) folded into Q

    def to_heads(t):                           # (tokens, E) -> (bt*H, S, d)
        t = t.reshape(bt, seq, num_heads, head_dim)
        t = jnp.transpose(t, (0, 2, 1, 3))
        return t.reshape(bt * num_heads, seq, head_dim)

    q = to_heads(qkv[:, :embed])
    k = to_heads(qkv[:, embed:2 * embed])
    v = to_heads(qkv[:, 2 * embed:])

    s = jnp.einsum('nqd,nkd->nqk', q.astype(cdt), k.astype(cdt),
                   preferred_element_type=jnp.float32)        # (bt*H, S, S)
    s = s - jnp.max(s, axis=-1, keepdims=True)
    p = jnp.exp(s)
    p = p * pl.reciprocal(jnp.sum(p, axis=-1, keepdims=True), approx=True)
    ctx = jnp.einsum('nqk,nkd->nqd', p.astype(cdt), v.astype(cdt),
                     preferred_element_type=jnp.float32)      # (bt*H, S, d)

    # Head-major concat back to token-major (tokens, E), then one Wo matmul
    # (the old H-way sum is now done for free by the MXU contraction over E).
    ctx = ctx.reshape(bt, num_heads, seq, head_dim)
    ctx = jnp.transpose(ctx, (0, 2, 1, 3)).reshape(tokens, embed)
    attn = jnp.dot(ctx.astype(cdt), wo_ref[0],
                   preferred_element_type=jnp.float32) + bo_ref[0]
    x2d = x2d + attn                                           # residual

    # ------------------------- MLP on LayerNorm_2(x) -------------------------
    h2 = _layer_norm(x2d, ln2_w_ref[0, 0], ln2_b_ref[0, 0]).astype(cdt)
    a1 = jnp.dot(h2, w1_ref[0], preferred_element_type=jnp.float32) + b1_ref[0]
    a1 = _gelu(a1)
    mlp = jnp.dot(a1.astype(cdt), w2_ref[0],
                  preferred_element_type=jnp.float32) + b2_ref[0]
    x2d = x2d + mlp                                            # residual

    @pl.when(layer < num_layers - 1)
    def _():
        o_ref[...] = x2d.reshape(bt, seq, embed).astype(o_ref.dtype)

    @pl.when(layer == num_layers - 1)
    def _():
        y = _layer_norm(x2d, lnf_w_ref[0], lnf_b_ref[0])
        o_ref[...] = y.reshape(bt, seq, embed).astype(o_ref.dtype)


def _prepare_kernel_params(params, compute_dtype):
    """PyTorch-layout params -> kernel layout (transposed, QKV-concat, scaled)."""
    L, E, _ = params["wq"].shape
    F = params["w1"].shape[1]
    scale = 1.0 / (E ** 0.5)   # NOTE: embed_size, not head_dim — matches torch module.

    def t(w):                  # PyTorch (L, out, in) -> (L, in, out)
        return jnp.swapaxes(w, 1, 2)

    wqkv = jnp.concatenate(
        [t(params["wq"]) * scale, t(params["wk"]), t(params["wv"])],
        axis=-1).astype(compute_dtype)                                   # (L, E, 3E)
    bqkv = jnp.concatenate(
        [params["bq"] * scale, params["bk"], params["bv"]],
        axis=-1).reshape(L, 1, 3 * E).astype(jnp.float32)

    wo = t(params["wo"]).astype(compute_dtype)                           # (L, E, E)
    bo = params["bo"].reshape(L, 1, E).astype(jnp.float32)
    w1 = t(params["w1"]).astype(compute_dtype)                           # (L, E, F)
    b1 = params["b1"].reshape(L, 1, F).astype(jnp.float32)
    w2 = t(params["w2"]).astype(compute_dtype)                           # (L, F, E)
    b2 = params["b2"].reshape(L, 1, E).astype(jnp.float32)

    ln1_w = params["ln1_w"].reshape(L, 1, E).astype(jnp.float32)
    ln1_b = params["ln1_b"].reshape(L, 1, E).astype(jnp.float32)
    ln2_w = params["ln2_w"].reshape(L, 1, E).astype(jnp.float32)
    ln2_b = params["ln2_b"].reshape(L, 1, E).astype(jnp.float32)
    lnf_w = params["lnf_w"].reshape(1, E).astype(jnp.float32)
    lnf_b = params["lnf_b"].reshape(1, E).astype(jnp.float32)

    return (ln1_w, ln1_b, wqkv, bqkv, wo, bo, ln2_w, ln2_b,
            w1, b1, w2, b2, lnf_w, lnf_b)


def _layer_spec(arr):
    """BlockSpec selecting layer `l` of a (num_layers, ...) stacked parameter."""
    nd = arr.ndim
    return pl.BlockSpec((1,) + arr.shape[1:],
                        lambda b, l, _nd=nd: (l,) + (0,) * (_nd - 1))


def _pick_vmem_limit_bytes():
    """~3/4 of physical VMEM (96 MiB on v5e/v6e, 48 MiB on v7x); safe fallback."""
    try:
        cap = pltpu.get_tpu_info().vmem_capacity_bytes
        return min((cap * 3) // 4, 100 * 1024 * 1024)
    except Exception:
        return 48 * 1024 * 1024


def _default_batch_tile(n, s):
    """Largest divisor of n with <= ~2048 tokens/step, keeping >= 2 grid steps."""
    best = 1
    for cand in range(1, n + 1):
        if n % cand:
            continue
        if cand * s > 2048:
            continue
        if n >= 2 and n // cand < 2:
            continue
        best = cand
    return best


def encoder_forward(x, params, *, num_heads, batch_tile=None,
                    compute_dtype=jnp.bfloat16):
    """x: (N, S, E) float32.  params: PyTorch-layout Encoder parameters."""
    N, S, E = x.shape
    num_layers = params["wq"].shape[0]
    assert E % num_heads == 0

    if batch_tile is None:
        batch_tile = _default_batch_tile(N, S)
    assert N % batch_tile == 0, "batch must be divisible by batch_tile"

    kparams = _prepare_kernel_params(params, compute_dtype)
    per_layer, final_ln = kparams[:-2], kparams[-2:]

    x_spec = pl.BlockSpec((batch_tile, S, E), lambda b, l: (b, 0, 0))
    in_specs = ([x_spec]
                + [_layer_spec(a) for a in per_layer]
                + [pl.BlockSpec((1, E), lambda b, l: (0, 0)) for _ in final_ln])
    out_spec = pl.BlockSpec((batch_tile, S, E), lambda b, l: (b, 0, 0))

    kernel = functools.partial(_encoder_kernel, num_heads=num_heads)

    return pl.pallas_call(
        kernel,
        out_shape=jax.ShapeDtypeStruct((N, S, E), x.dtype),
        grid_spec=pltpu.PrefetchScalarGridSpec(
            num_scalar_prefetch=0,
            grid=(N // batch_tile, num_layers),
            in_specs=in_specs,
            out_specs=out_spec,
        ),
        compiler_params=pltpu.CompilerParams(
            dimension_semantics=("parallel", "arbitrary"),
            vmem_limit_bytes=_pick_vmem_limit_bytes(),
        ),
    )(x, *kparams)


def _reference_encoder(x, params, num_heads):
    """Pure-JAX reference mirroring the PyTorch Encoder forward (eval mode)."""
    E = x.shape[-1]
    L = params["wq"].shape[0]
    d = E // num_heads

    def ln(v, w, b, eps=1e-5):
        mu = v.mean(axis=-1, keepdims=True)
        var = ((v - mu) ** 2).mean(axis=-1, keepdims=True)
        return (v - mu) / jnp.sqrt(var + eps) * w + b

    for l in range(L):
        h = ln(x, params["ln1_w"][l], params["ln1_b"][l])
        q = h @ params["wq"][l].T + params["bq"][l]
        k = h @ params["wk"][l].T + params["bk"][l]
        v = h @ params["wv"][l].T + params["bv"][l]
        heads = []
        for hh in range(num_heads):
            sl = slice(hh * d, (hh + 1) * d)
            e = jnp.einsum('nqd,nkd->nqk', q[..., sl], k[..., sl]) / (E ** 0.5)
            a = jax.nn.softmax(e, axis=-1)
            heads.append(jnp.einsum('nql,nld->nqd', a, v[..., sl]))
        attn = jnp.concatenate(heads, axis=-1) @ params["wo"][l].T + params["bo"][l]
        x = x + attn
        h2 = ln(x, params["ln2_w"][l], params["ln2_b"][l])
        m = jax.nn.gelu(h2 @ params["w1"][l].T + params["b1"][l], approximate=False)
        m = m @ params["w2"][l].T + params["b2"][l]
        x = x + m
    return ln(x, params["lnf_w"], params["lnf_b"])


def make_encoder_params(key, num_layers, embed_size, hidden_size):
    """Deterministic synthetic params in PyTorch nn.Linear layout: W is (out, in)."""
    def linear(k, out_dim, in_dim):
        kw, kb = jax.random.split(k)
        s = 1.0 / (in_dim ** 0.5)
        w = jax.random.uniform(kw, (num_layers, out_dim, in_dim), jnp.float32, -s, s)
        b = jax.random.uniform(kb, (num_layers, out_dim), jnp.float32, -s, s)
        return w, b

    def layer_norm_params(k, shape):
        k1, k2 = jax.random.split(k)
        return (1.0 + 0.1 * jax.random.normal(k1, shape, jnp.float32),
                0.1 * jax.random.normal(k2, shape, jnp.float32))

    ks = jax.random.split(key, 9)
    p = {}
    p["wq"], p["bq"] = linear(ks[0], embed_size, embed_size)
    p["wk"], p["bk"] = linear(ks[1], embed_size, embed_size)
    p["wv"], p["bv"] = linear(ks[2], embed_size, embed_size)
    p["wo"], p["bo"] = linear(ks[3], embed_size, embed_size)
    p["w1"], p["b1"] = linear(ks[4], hidden_size, embed_size)
    p["w2"], p["b2"] = linear(ks[5], embed_size, hidden_size)
    p["ln1_w"], p["ln1_b"] = layer_norm_params(ks[6], (num_layers, embed_size))
    p["ln2_w"], p["ln2_b"] = layer_norm_params(ks[7], (num_layers, embed_size))
    p["lnf_w"], p["lnf_b"] = layer_norm_params(ks[8], (embed_size,))
    return p


if __name__ == "__main__":
    # Small shapes consistent with the module: batch=4, seq=8, embed=32,
    # heads=4, forward_expansion=2, 2 encoder layers.
    batch, seq, embed = 4, 8, 32
    num_heads, forward_expansion, num_layers = 4, 2, 2
    hidden = forward_expansion * embed

    key = jax.random.PRNGKey(0)
    kx, kp = jax.random.split(key)
    x = jax.random.normal(kx, (batch, seq, embed), dtype=jnp.float32)
    params = make_encoder_params(kp, num_layers, embed, hidden)

    # batch_tile=2 -> grid (2, 2): 2 batch elements folded into the matmul M
    # dimension per step, while keeping 2 "parallel" steps for v7x's dual TCs.
    # (For real workloads the default heuristic targets ~2048 tokens/step.)
    out = encoder_forward(x, params, num_heads=num_heads, batch_tile=2)
    out = jax.block_until_ready(out)

    ref = _reference_encoder(x, params, num_heads)
    assert out.shape == (batch, seq, embed)
    max_err = float(jnp.max(jnp.abs(out - ref)))
    # bf16 MXU operands + approx reciprocal + tanh-GELU => relaxed tolerance.
    assert max_err < 5e-2, f"mismatch vs reference: max abs err {max_err}"
    print("KERNEL_OK")
</pallas_src>

<mosaic_0001>
module attributes {stable_mosaic.version = 11 : i64} {
  func.func @_encoder_kernel(%arg0: i32, %arg1: i32, %arg2: memref<2x8x32xf32, #tpu.memory_space<vmem>>, %arg3: memref<1x1x32xf32, #tpu.memory_space<vmem>>, %arg4: memref<1x1x32xf32, #tpu.memory_space<vmem>>, %arg5: memref<1x32x96xbf16, #tpu.memory_space<vmem>>, %arg6: memref<1x1x96xf32, #tpu.memory_space<vmem>>, %arg7: memref<1x32x32xbf16, #tpu.memory_space<vmem>>, %arg8: memref<1x1x32xf32, #tpu.memory_space<vmem>>, %arg9: memref<1x1x32xf32, #tpu.memory_space<vmem>>, %arg10: memref<1x1x32xf32, #tpu.memory_space<vmem>>, %arg11: memref<1x32x64xbf16, #tpu.memory_space<vmem>>, %arg12: memref<1x1x64xf32, #tpu.memory_space<vmem>>, %arg13: memref<1x64x32xbf16, #tpu.memory_space<vmem>>, %arg14: memref<1x1x32xf32, #tpu.memory_space<vmem>>, %arg15: memref<1x32xf32, #tpu.memory_space<vmem>>, %arg16: memref<1x32xf32, #tpu.memory_space<vmem>>, %arg17: memref<2x8x32xf32, #tpu.memory_space<vmem>>) attributes {dimension_semantics = [#tpu.dimension_semantics<parallel>, #tpu.dimension_semantics<arbitrary>], iteration_bounds = array<i64: 2, 2>, scalar_prefetch = 0 : i64, scratch_operands = 0 : i64, tpu.core_type = #tpu.core_type<tc>, window_params = [{transform_indices = @transform_0, window_bounds = array<i64: 2, 8, 32>}, {transform_indices = @transform_1, window_bounds = array<i64: 1, 1, 32>}, {transform_indices = @transform_2, window_bounds = array<i64: 1, 1, 32>}, {transform_indices = @transform_3, window_bounds = array<i64: 1, 32, 96>}, {transform_indices = @transform_4, window_bounds = array<i64: 1, 1, 96>}, {transform_indices = @transform_5, window_bounds = array<i64: 1, 32, 32>}, {transform_indices = @transform_6, window_bounds = array<i64: 1, 1, 32>}, {transform_indices = @transform_7, window_bounds = array<i64: 1, 1, 32>}, {transform_indices = @transform_8, window_bounds = array<i64: 1, 1, 32>}, {transform_indices = @transform_9, window_bounds = array<i64: 1, 32, 64>}, {transform_indices = @transform_10, window_bounds = array<i64: 1, 1, 64>}, {transform_indices = @transform_11, window_bounds = array<i64: 1, 64, 32>}, {transform_indices = @transform_12, window_bounds = array<i64: 1, 1, 32>}, {pipeline_mode = #tpu.pipeline_mode<synchronous>, transform_indices = @transform_13, window_bounds = array<i64: 1, 32>}, {pipeline_mode = #tpu.pipeline_mode<synchronous>, transform_indices = @transform_14, window_bounds = array<i64: 1, 32>}, {transform_indices = @transform_15, window_bounds = array<i64: 2, 8, 32>}]} {
    %c0_i32 = arith.constant 0 : i32
    %0 = arith.cmpi eq, %arg1, %c0_i32 : i32
    %1 = arith.extui %0 : i1 to i32
    %c0_i32_0 = arith.constant 0 : i32
    %2 = arith.cmpi ne, %1, %c0_i32_0 : i32
    scf.if %2 {
      %c0_63 = arith.constant 0 : index
      %c0_64 = arith.constant 0 : index
      %c0_65 = arith.constant 0 : index
      %141 = vector.load %arg2[%c0_63, %c0_64, %c0_65] : memref<2x8x32xf32, #tpu.memory_space<vmem>>, vector<2x8x32xf32>
      %c0_66 = arith.constant 0 : index
      %c0_67 = arith.constant 0 : index
      %c0_68 = arith.constant 0 : index
      %142 = vector.load %arg17[%c0_66, %c0_67, %c0_68] : memref<2x8x32xf32, #tpu.memory_space<vmem>>, vector<2x8x32xf32>
      tpu.vector_store %arg17[%c0_66, %c0_67, %c0_68], %141 {strides = array<i32>} : memref<2x8x32xf32, #tpu.memory_space<vmem>>, vector<2x8x32xf32>,
    } else {
    }
    %c0 = arith.constant 0 : index
    %c0_1 = arith.constant 0 : index
    %c0_2 = arith.constant 0 : index
    %3 = vector.load %arg17[%c0, %c0_1, %c0_2] : memref<2x8x32xf32, #tpu.memory_space<vmem>>, vector<2x8x32xf32>
    %4 = vector.shape_cast %3 : vector<2x8x32xf32> to vector<16x32xf32>
    %c0_3 = arith.constant 0 : index
    %c0_4 = arith.constant 0 : index
    %c0_5 = arith.constant 0 : index
    %5 = vector.load %arg3[%c0_3, %c0_4, %c0_5] : memref<1x1x32xf32, #tpu.memory_space<vmem>>, vector<1x1x32xf32>
    %6 = vector.shape_cast %5 : vector<1x1x32xf32> to vector<32xf32>
    %c0_6 = arith.constant 0 : index
    %c0_7 = arith.constant 0 : index
    %c0_8 = arith.constant 0 : index
    %7 = vector.load %arg4[%c0_6, %c0_7, %c0_8] : memref<1x1x32xf32, #tpu.memory_space<vmem>>, vector<1x1x32xf32>
    %8 = vector.shape_cast %7 : vector<1x1x32xf32> to vector<32xf32>
    %cst = arith.constant dense<0.000000e+00> : vector<16xf32>
    %9 = vector.multi_reduction <add>, %4, %cst [1] : vector<16x32xf32> to vector<16xf32>
    %10 = vector.shape_cast %9 : vector<16xf32> to vector<16x1xf32>
    %cst_9 = arith.constant 3.200000e+01 : f32
    %11 = vector.broadcast %cst_9 : f32 to vector<16x1xf32>
    %12 = arith.divf %10, %11 : vector<16x1xf32>
    %13 = vector.broadcast %12 : vector<16x1xf32> to vector<16x32xf32>
    %14 = arith.subf %4, %13 : vector<16x32xf32>
    %15 = arith.mulf %14, %14 : vector<16x32xf32>
    %cst_10 = arith.constant dense<0.000000e+00> : vector<16xf32>
    %16 = vector.multi_reduction <add>, %15, %cst_10 [1] : vector<16x32xf32> to vector<16xf32>
    %17 = vector.shape_cast %16 : vector<16xf32> to vector<16x1xf32>
    %cst_11 = arith.constant 3.200000e+01 : f32
    %18 = vector.broadcast %cst_11 : f32 to vector<16x1xf32>
    %19 = arith.divf %17, %18 : vector<16x1xf32>
    %cst_12 = arith.constant 9.99999974E-6 : f32
    %20 = vector.broadcast %cst_12 : f32 to vector<16x1xf32>
    %21 = arith.addf %19, %20 : vector<16x1xf32>
    %22 = math.rsqrt %21 : vector<16x1xf32>
    %23 = vector.broadcast %22 : vector<16x1xf32> to vector<16x32xf32>
    %24 = arith.mulf %14, %23 : vector<16x32xf32>
    %25 = vector.shape_cast %6 : vector<32xf32> to vector<1x32xf32>
    %26 = vector.broadcast %25 : vector<1x32xf32> to vector<16x32xf32>
    %27 = arith.mulf %24, %26 : vector<16x32xf32>
    %28 = vector.shape_cast %8 : vector<32xf32> to vector<1x32xf32>
    %29 = vector.broadcast %28 : vector<1x32xf32> to vector<16x32xf32>
    %30 = arith.addf %27, %29 : vector<16x32xf32>
    %31 = arith.truncf %30 : vector<16x32xf32> to vector<16x32xbf16>
    %c0_13 = arith.constant 0 : index
    %c0_14 = arith.constant 0 : index
    %c0_15 = arith.constant 0 : index
    %32 = vector.load %arg5[%c0_13, %c0_14, %c0_15] : memref<1x32x96xbf16, #tpu.memory_space<vmem>>, vector<1x32x96xbf16>
    %33 = vector.shape_cast %32 : vector<1x32x96xbf16> to vector<32x96xbf16>
    %cst_16 = arith.constant dense<0.000000e+00> : vector<16x96xf32>
    %34 = tpu.matmul %31, %33, %cst_16 {dimension_numbers = #tpu.dot_dimension_numbers<[1], [0], [0], [1], [0, 0, 1, 1], [], []>} : vector<16x32xbf16>, vector<32x96xbf16>, vector<16x96xf32> -> vector<16x96xf32>
    %c0_17 = arith.constant 0 : index
    %c0_18 = arith.constant 0 : index
    %c0_19 = arith.constant 0 : index
    %35 = vector.load %arg6[%c0_17, %c0_18, %c0_19] : memref<1x1x96xf32, #tpu.memory_space<vmem>>, vector<1x1x96xf32>
    %36 = vector.shape_cast %35 : vector<1x1x96xf32> to vector<1x96xf32>
    %37 = vector.broadcast %36 : vector<1x96xf32> to vector<16x96xf32>
    %38 = arith.addf %34, %37 : vector<16x96xf32>
    %39 = vector.extract_strided_slice %38 {offsets = [0, 0], sizes = [16, 32], strides = [1, 1]} : vector<16x96xf32> to vector<16x32xf32>
    %40 = vector.shape_cast %39 : vector<16x32xf32> to vector<2x8x4x8xf32>
    %41 = tpu.transpose %40, [0, 2, 1, 3] : vector<2x8x4x8xf32> -> vector<2x4x8x8xf32>
    %42 = vector.shape_cast %41 : vector<2x4x8x8xf32> to vector<8x8x8xf32>
    %43 = vector.extract_strided_slice %38 {offsets = [0, 32], sizes = [16, 32], strides = [1, 1]} : vector<16x96xf32> to vector<16x32xf32>
    %44 = vector.shape_cast %43 : vector<16x32xf32> to vector<2x8x4x8xf32>
    %45 = tpu.transpose %44, [0, 2, 1, 3] : vector<2x8x4x8xf32> -> vector<2x4x8x8xf32>
    %46 = vector.shape_cast %45 : vector<2x4x8x8xf32> to vector<8x8x8xf32>
    %47 = vector.extract_strided_slice %38 {offsets = [0, 64], sizes = [16, 32], strides = [1, 1]} : vector<16x96xf32> to vector<16x32xf32>
    %48 = vector.shape_cast %47 : vector<16x32xf32> to vector<2x8x4x8xf32>
    %49 = tpu.transpose %48, [0, 2, 1, 3] : vector<2x8x4x8xf32> -> vector<2x4x8x8xf32>
    %50 = vector.shape_cast %49 : vector<2x4x8x8xf32> to vector<8x8x8xf32>
    %51 = arith.truncf %42 : vector<8x8x8xf32> to vector<8x8x8xbf16>
    %52 = arith.truncf %46 : vector<8x8x8xf32> to vector<8x8x8xbf16>
    "tpu.trace_start"() <{level = 10 : i32, message = "nqd,nkd->nqk"}> : () -> ()
    %cst_20 = arith.constant dense<0.000000e+00> : vector<8x8x8xf32>
    %53 = tpu.matmul %51, %52, %cst_20 {dimension_numbers = #tpu.dot_dimension_numbers<[2], [2], [1], [1], [0, 0, 0, 1, 1, 1], [0], [0]>} : vector<8x8x8xbf16>, vector<8x8x8xbf16>, vector<8x8x8xf32> -> vector<8x8x8xf32>
    "tpu.trace_stop"() : () -> ()
    %cst_21 = arith.constant dense<0xFF800000> : vector<8x8xf32>
    %54 = vector.multi_reduction <maximumf>, %53, %cst_21 [2] : vector<8x8x8xf32> to vector<8x8xf32>
    %55 = vector.shape_cast %54 : vector<8x8xf32> to vector<8x8x1xf32>
    %56 = vector.broadcast %55 : vector<8x8x1xf32> to vector<8x8x8xf32>
    %57 = arith.subf %53, %56 : vector<8x8x8xf32>
    %58 = math.exp %57 : vector<8x8x8xf32>
    %cst_22 = arith.constant dense<0.000000e+00> : vector<8x8xf32>
    %59 = vector.multi_reduction <add>, %58, %cst_22 [2] : vector<8x8x8xf32> to vector<8x8xf32>
    %60 = vector.shape_cast %59 : vector<8x8xf32> to vector<8x8x1xf32>
    %61 = tpu.reciprocal %60 {approx = true} : vector<8x8x1xf32> -> vector<8x8x1xf32>
    %62 = vector.broadcast %61 : vector<8x8x1xf32> to vector<8x8x8xf32>
    %63 = arith.mulf %58, %62 : vector<8x8x8xf32>
    %64 = arith.truncf %63 : vector<8x8x8xf32> to vector<8x8x8xbf16>
    %65 = arith.truncf %50 : vector<8x8x8xf32> to vector<8x8x8xbf16>
    "tpu.trace_start"() <{level = 10 : i32, message = "nqk,nkd->nqd"}> : () -> ()
    %cst_23 = arith.constant dense<0.000000e+00> : vector<8x8x8xf32>
    %66 = tpu.matmul %64, %65, %cst_23 {dimension_numbers = #tpu.dot_dimension_numbers<[2], [1], [1], [2], [0, 0, 0, 1, 1, 2], [0], [0]>} : vector<8x8x8xbf16>, vector<8x8x8xbf16>, vector<8x8x8xf32> -> vector<8x8x8xf32>
    "tpu.trace_stop"() : () -> ()
    %67 = vector.shape_cast %66 : vector<8x8x8xf32> to vector<2x4x8x8xf32>
    %68 = tpu.transpose %67, [0, 2, 1, 3] : vector<2x4x8x8xf32> -> vector<2x8x4x8xf32>
    %69 = vector.shape_cast %68 : vector<2x8x4x8xf32> to vector<16x32xf32>
    %70 = arith.truncf %69 : vector<16x32xf32> to vector<16x32xbf16>
    %c0_24 = arith.constant 0 : index
    %c0_25 = arith.constant 0 : index
    %c0_26 = arith.constant 0 : index
    %71 = vector.load %arg7[%c0_24, %c0_25, %c0_26] : memref<1x32x32xbf16, #tpu.memory_space<vmem>>, vector<1x32x32xbf16>
    %72 = vector.shape_cast %71 : vector<1x32x32xbf16> to vector<32x32xbf16>
    %cst_27 = arith.constant dense<0.000000e+00> : vector<16x32xf32>
    %73 = tpu.matmul %70, %72, %cst_27 {dimension_numbers = #tpu.dot_dimension_numbers<[1], [0], [0], [1], [0, 0, 1, 1], [], []>} : vector<16x32xbf16>, vector<32x32xbf16>, vector<16x32xf32> -> vector<16x32xf32>
    %c0_28 = arith.constant 0 : index
    %c0_29 = arith.constant 0 : index
    %c0_30 = arith.constant 0 : index
    %74 = vector.load %arg8[%c0_28, %c0_29, %c0_30] : memref<1x1x32xf32, #tpu.memory_space<vmem>>, vector<1x1x32xf32>
    %75 = vector.shape_cast %74 : vector<1x1x32xf32> to vector<1x32xf32>
    %76 = vector.broadcast %75 : vector<1x32xf32> to vector<16x32xf32>
    %77 = arith.addf %73, %76 : vector<16x32xf32>
    %78 = arith.addf %4, %77 : vector<16x32xf32>
    %c0_31 = arith.constant 0 : index
    %c0_32 = arith.constant 0 : index
    %c0_33 = arith.constant 0 : index
    %79 = vector.load %arg9[%c0_31, %c0_32, %c0_33] : memref<1x1x32xf32, #tpu.memory_space<vmem>>, vector<1x1x32xf32>
    %80 = vector.shape_cast %79 : vector<1x1x32xf32> to vector<32xf32>
    %c0_34 = arith.constant 0 : index
    %c0_35 = arith.constant 0 : index
    %c0_36 = arith.constant 0 : index
    %81 = vector.load %arg10[%c0_34, %c0_35, %c0_36] : memref<1x1x32xf32, #tpu.memory_space<vmem>>, vector<1x1x32xf32>
    %82 = vector.shape_cast %81 : vector<1x1x32xf32> to vector<32xf32>
    %cst_37 = arith.constant dense<0.000000e+00> : vector<16xf32>
    %83 = vector.multi_reduction <add>, %78, %cst_37 [1] : vector<16x32xf32> to vector<16xf32>
    %84 = vector.shape_cast %83 : vector<16xf32> to vector<16x1xf32>
    %cst_38 = arith.constant 3.200000e+01 : f32
    %85 = vector.broadcast %cst_38 : f32 to vector<16x1xf32>
    %86 = arith.divf %84, %85 : vector<16x1xf32>
    %87 = vector.broadcast %86 : vector<16x1xf32> to vector<16x32xf32>
    %88 = arith.subf %78, %87 : vector<16x32xf32>
    %89 = arith.mulf %88, %88 : vector<16x32xf32>
    %cst_39 = arith.constant dense<0.000000e+00> : vector<16xf32>
    %90 = vector.multi_reduction <add>, %89, %cst_39 [1] : vector<16x32xf32> to vector<16xf32>
    %91 = vector.shape_cast %90 : vector<16xf32> to vector<16x1xf32>
    %cst_40 = arith.constant 3.200000e+01 : f32
    %92 = vector.broadcast %cst_40 : f32 to vector<16x1xf32>
    %93 = arith.divf %91, %92 : vector<16x1xf32>
    %cst_41 = arith.constant 9.99999974E-6 : f32
    %94 = vector.broadcast %cst_41 : f32 to vector<16x1xf32>
    %95 = arith.addf %93, %94 : vector<16x1xf32>
    %96 = math.rsqrt %95 : vector<16x1xf32>
    %97 = vector.broadcast %96 : vector<16x1xf32> to vector<16x32xf32>
    %98 = arith.mulf %88, %97 : vector<16x32xf32>
    %99 = vector.shape_cast %80 : vector<32xf32> to vector<1x32xf32>
    %100 = vector.broadcast %99 : vector<1x32xf32> to vector<16x32xf32>
    %101 = arith.mulf %98, %100 : vector<16x32xf32>
    %102 = vector.shape_cast %82 : vector<32xf32> to vector<1x32xf32>
    %103 = vector.broadcast %102 : vector<1x32xf32> to vector<16x32xf32>
    %104 = arith.addf %101, %103 : vector<16x32xf32>
    %105 = arith.truncf %104 : vector<16x32xf32> to vector<16x32xbf16>
    %c0_42 = arith.constant 0 : index
    %c0_43 = arith.constant 0 : index
    %c0_44 = arith.constant 0 : index
    %106 = vector.load %arg11[%c0_42, %c0_43, %c0_44] : memref<1x32x64xbf16, #tpu.memory_space<vmem>>, vector<1x32x64xbf16>
    %107 = vector.shape_cast %106 : vector<1x32x64xbf16> to vector<32x64xbf16>
    %cst_45 = arith.constant dense<0.000000e+00> : vector<16x64xf32>
    %108 = tpu.matmul %105, %107, %cst_45 {dimension_numbers = #tpu.dot_dimension_numbers<[1], [0], [0], [1], [0, 0, 1, 1], [], []>} : vector<16x32xbf16>, vector<32x64xbf16>, vector<16x64xf32> -> vector<16x64xf32>
    %c0_46 = arith.constant 0 : index
    %c0_47 = arith.constant 0 : index
    %c0_48 = arith.constant 0 : index
    %109 = vector.load %arg12[%c0_46, %c0_47, %c0_48] : memref<1x1x64xf32, #tpu.memory_space<vmem>>, vector<1x1x64xf32>
    %110 = vector.shape_cast %109 : vector<1x1x64xf32> to vector<1x64xf32>
    %111 = vector.broadcast %110 : vector<1x64xf32> to vector<16x64xf32>
    %112 = arith.addf %108, %111 : vector<16x64xf32>
    %cst_49 = arith.constant 5.000000e-01 : f32
    %113 = vector.broadcast %cst_49 : f32 to vector<16x64xf32>
    %114 = arith.mulf %113, %112 : vector<16x64xf32>
    %cst_50 = arith.constant 4.471500e-02 : f32
    %115 = vector.broadcast %cst_50 : f32 to vector<16x64xf32>
    %116 = arith.mulf %115, %112 : vector<16x64xf32>
    %117 = arith.mulf %116, %112 : vector<16x64xf32>
    %118 = arith.mulf %117, %112 : vector<16x64xf32>
    %119 = arith.addf %112, %118 : vector<16x64xf32>
    %cst_51 = arith.constant 0.797884583 : f32
    %120 = vector.broadcast %cst_51 : f32 to vector<16x64xf32>
    %121 = arith.mulf %120, %119 : vector<16x64xf32>
    %122 = math.tanh %121 : vector<16x64xf32>
    %cst_52 = arith.constant 1.000000e+00 : f32
    %123 = vector.broadcast %cst_52 : f32 to vector<16x64xf32>
    %124 = arith.addf %123, %122 : vector<16x64xf32>
    %125 = arith.mulf %114, %124 : vector<16x64xf32>
    %126 = arith.truncf %125 : vector<16x64xf32> to vector<16x64xbf16>
    %c0_53 = arith.constant 0 : index
    %c0_54 = arith.constant 0 : index
    %c0_55 = arith.constant 0 : index
    %127 = vector.load %arg13[%c0_53, %c0_54, %c0_55] : memref<1x64x32xbf16, #tpu.memory_space<vmem>>, vector<1x64x32xbf16>
    %128 = vector.shape_cast %127 : vector<1x64x32xbf16> to vector<64x32xbf16>
    %cst_56 = arith.constant dense<0.000000e+00> : vector<16x32xf32>
    %129 = tpu.matmul %126, %128, %cst_56 {dimension_numbers = #tpu.dot_dimension_numbers<[1], [0], [0], [1], [0, 0, 1, 1], [], []>} : vector<16x64xbf16>, vector<64x32xbf16>, vector<16x32xf32> -> vector<16x32xf32>
    %c0_57 = arith.constant 0 : index
    %c0_58 = arith.constant 0 : index
    %c0_59 = arith.constant 0 : index
    %130 = vector.load %arg14[%c0_57, %c0_58, %c0_59] : memref<1x1x32xf32, #tpu.memory_space<vmem>>, vector<1x1x32xf32>
    %131 = vector.shape_cast %130 : vector<1x1x32xf32> to vector<1x32xf32>
    %132 = vector.broadcast %131 : vector<1x32xf32> to vector<16x32xf32>
    %133 = arith.addf %129, %132 : vector<16x32xf32>
    %134 = arith.addf %78, %133 : vector<16x32xf32>
    %c1_i32 = arith.constant 1 : i32
    %135 = arith.cmpi slt, %arg1, %c1_i32 : i32
    %136 = arith.extui %135 : i1 to i32
    %c0_i32_60 = arith.constant 0 : i32
    %137 = arith.cmpi ne, %136, %c0_i32_60 : i32
    scf.if %137 {
      %141 = vector.shape_cast %134 : vector<16x32xf32> to vector<2x8x32xf32>
      %c0_63 = arith.constant 0 : index
      %c0_64 = arith.constant 0 : index
      %c0_65 = arith.constant 0 : index
      %142 = vector.load %arg17[%c0_63, %c0_64, %c0_65] : memref<2x8x32xf32, #tpu.memory_space<vmem>>, vector<2x8x32xf32>
      tpu.vector_store %arg17[%c0_63, %c0_64, %c0_65], %141 {strides = array<i32>} : memref<2x8x32xf32, #tpu.memory_space<vmem>>, vector<2x8x32xf32>,
    } else {
    }
    %c1_i32_61 = arith.constant 1 : i32
    %138 = arith.cmpi eq, %arg1, %c1_i32_61 : i32
    %139 = arith.extui %138 : i1 to i32
    %c0_i32_62 = arith.constant 0 : i32
    %140 = arith.cmpi ne, %139, %c0_i32_62 : i32
    scf.if %140 {
      %c0_63 = arith.constant 0 : index
      %c0_64 = arith.constant 0 : index
      %141 = vector.load %arg15[%c0_63, %c0_64] : memref<1x32xf32, #tpu.memory_space<vmem>>, vector<1x32xf32>
      %142 = vector.shape_cast %141 : vector<1x32xf32> to vector<32xf32>
      %c0_65 = arith.constant 0 : index
      %c0_66 = arith.constant 0 : index
      %143 = vector.load %arg16[%c0_65, %c0_66] : memref<1x32xf32, #tpu.memory_space<vmem>>, vector<1x32xf32>
      %144 = vector.shape_cast %143 : vector<1x32xf32> to vector<32xf32>
      %cst_67 = arith.constant dense<0.000000e+00> : vector<16xf32>
      %145 = vector.multi_reduction <add>, %134, %cst_67 [1] : vector<16x32xf32> to vector<16xf32>
      %146 = vector.shape_cast %145 : vector<16xf32> to vector<16x1xf32>
      %cst_68 = arith.constant 3.200000e+01 : f32
      %147 = vector.broadcast %cst_68 : f32 to vector<16x1xf32>
      %148 = arith.divf %146, %147 : vector<16x1xf32>
      %149 = vector.broadcast %148 : vector<16x1xf32> to vector<16x32xf32>
      %150 = arith.subf %134, %149 : vector<16x32xf32>
      %151 = arith.mulf %150, %150 : vector<16x32xf32>
      %cst_69 = arith.constant dense<0.000000e+00> : vector<16xf32>
      %152 = vector.multi_reduction <add>, %151, %cst_69 [1] : vector<16x32xf32> to vector<16xf32>
      %153 = vector.shape_cast %152 : vector<16xf32> to vector<16x1xf32>
      %cst_70 = arith.constant 3.200000e+01 : f32
      %154 = vector.broadcast %cst_70 : f32 to vector<16x1xf32>
      %155 = arith.divf %153, %154 : vector<16x1xf32>
      %cst_71 = arith.constant 9.99999974E-6 : f32
      %156 = vector.broadcast %cst_71 : f32 to vector<16x1xf32>
      %157 = arith.addf %155, %156 : vector<16x1xf32>
      %158 = math.rsqrt %157 : vector<16x1xf32>
      %159 = vector.broadcast %158 : vector<16x1xf32> to vector<16x32xf32>
      %160 = arith.mulf %150, %159 : vector<16x32xf32>
      %161 = vector.shape_cast %142 : vector<32xf32> to vector<1x32xf32>
      %162 = vector.broadcast %161 : vector<1x32xf32> to vector<16x32xf32>
      %163 = arith.mulf %160, %162 : vector<16x32xf32>
      %164 = vector.shape_cast %144 : vector<32xf32> to vector<1x32xf32>
      %165 = vector.broadcast %164 : vector<1x32xf32> to vector<16x32xf32>
      %166 = arith.addf %163, %165 : vector<16x32xf32>
      %167 = vector.shape_cast %166 : vector<16x32xf32> to vector<2x8x32xf32>
      %c0_72 = arith.constant 0 : index
      %c0_73 = arith.constant 0 : index
      %c0_74 = arith.constant 0 : index
      %168 = vector.load %arg17[%c0_72, %c0_73, %c0_74] : memref<2x8x32xf32, #tpu.memory_space<vmem>>, vector<2x8x32xf32>
      tpu.vector_store %arg17[%c0_72, %c0_73, %c0_74], %167 {strides = array<i32>} : memref<2x8x32xf32, #tpu.memory_space<vmem>>, vector<2x8x32xf32>,
    } else {
    }
    return
  }
  func.func @transform_0(%arg0: i32, %arg1: i32) -> (i32, i32, i32) {
    %c0_i32 = arith.constant 0 : i32
    %c0_i32_0 = arith.constant 0 : i32
    %c0_i32_1 = arith.constant 0 : i32
    return %arg0, %c0_i32, %c0_i32_0 : i32, i32, i32
  }
  func.func @transform_1(%arg0: i32, %arg1: i32) -> (i32, i32, i32) {
    %c0_i32 = arith.constant 0 : i32
    %c0_i32_0 = arith.constant 0 : i32
    %c0_i32_1 = arith.constant 0 : i32
    return %arg1, %c0_i32, %c0_i32_0 : i32, i32, i32
  }
  func.func @transform_2(%arg0: i32, %arg1: i32) -> (i32, i32, i32) {
    %c0_i32 = arith.constant 0 : i32
    %c0_i32_0 = arith.constant 0 : i32
    %c0_i32_1 = arith.constant 0 : i32
    return %arg1, %c0_i32, %c0_i32_0 : i32, i32, i32
  }
  func.func @transform_3(%arg0: i32, %arg1: i32) -> (i32, i32, i32) {
    %c0_i32 = arith.constant 0 : i32
    %c0_i32_0 = arith.constant 0 : i32
    %c0_i32_1 = arith.constant 0 : i32
    return %arg1, %c0_i32, %c0_i32_0 : i32, i32, i32
  }
  func.func @transform_4(%arg0: i32, %arg1: i32) -> (i32, i32, i32) {
    %c0_i32 = arith.constant 0 : i32
    %c0_i32_0 = arith.constant 0 : i32
    %c0_i32_1 = arith.constant 0 : i32
    return %arg1, %c0_i32, %c0_i32_0 : i32, i32, i32
  }
  func.func @transform_5(%arg0: i32, %arg1: i32) -> (i32, i32, i32) {
    %c0_i32 = arith.constant 0 : i32
    %c0_i32_0 = arith.constant 0 : i32
    %c0_i32_1 = arith.constant 0 : i32
    return %arg1, %c0_i32, %c0_i32_0 : i32, i32, i32
  }
  func.func @transform_6(%arg0: i32, %arg1: i32) -> (i32, i32, i32) {
    %c0_i32 = arith.constant 0 : i32
    %c0_i32_0 = arith.constant 0 : i32
    %c0_i32_1 = arith.constant 0 : i32
    return %arg1, %c0_i32, %c0_i32_0 : i32, i32, i32
  }
  func.func @transform_7(%arg0: i32, %arg1: i32) -> (i32, i32, i32) {
    %c0_i32 = arith.constant 0 : i32
    %c0_i32_0 = arith.constant 0 : i32
    %c0_i32_1 = arith.constant 0 : i32
    return %arg1, %c0_i32, %c0_i32_0 : i32, i32, i32
  }
  func.func @transform_8(%arg0: i32, %arg1: i32) -> (i32, i32, i32) {
    %c0_i32 = arith.constant 0 : i32
    %c0_i32_0 = arith.constant 0 : i32
    %c0_i32_1 = arith.constant 0 : i32
    return %arg1, %c0_i32, %c0_i32_0 : i32, i32, i32
  }
  func.func @transform_9(%arg0: i32, %arg1: i32) -> (i32, i32, i32) {
    %c0_i32 = arith.constant 0 : i32
    %c0_i32_0 = arith.constant 0 : i32
    %c0_i32_1 = arith.constant 0 : i32
    return %arg1, %c0_i32, %c0_i32_0 : i32, i32, i32
  }
  func.func @transform_10(%arg0: i32, %arg1: i32) -> (i32, i32, i32) {
    %c0_i32 = arith.constant 0 : i32
    %c0_i32_0 = arith.constant 0 : i32
    %c0_i32_1 = arith.constant 0 : i32
    return %arg1, %c0_i32, %c0_i32_0 : i32, i32, i32
  }
  func.func @transform_11(%arg0: i32, %arg1: i32) -> (i32, i32, i32) {
    %c0_i32 = arith.constant 0 : i32
    %c0_i32_0 = arith.constant 0 : i32
    %c0_i32_1 = arith.constant 0 : i32
    return %arg1, %c0_i32, %c0_i32_0 : i32, i32, i32
  }
  func.func @transform_12(%arg0: i32, %arg1: i32) -> (i32, i32, i32) {
    %c0_i32 = arith.constant 0 : i32
    %c0_i32_0 = arith.constant 0 : i32
    %c0_i32_1 = arith.constant 0 : i32
    return %arg1, %c0_i32, %c0_i32_0 : i32, i32, i32
  }
  func.func @transform_13(%arg0: i32, %arg1: i32) -> (i32, i32) {
    %c0_i32 = arith.constant 0 : i32
    %c0_i32_0 = arith.constant 0 : i32
    %c0_i32_1 = arith.constant 0 : i32
    return %c0_i32, %c0_i32_0 : i32, i32
  }
  func.func @transform_14(%arg0: i32, %arg1: i32) -> (i32, i32) {
    %c0_i32 = arith.constant 0 : i32
    %c0_i32_0 = arith.constant 0 : i32
    %c0_i32_1 = arith.constant 0 : i32
    return %c0_i32, %c0_i32_0 : i32, i32
  }
  func.func @transform_15(%arg0: i32, %arg1: i32) -> (i32, i32, i32) {
    %c0_i32 = arith.constant 0 : i32
    %c0_i32_0 = arith.constant 0 : i32
    %c0_i32_1 = arith.constant 0 : i32
    return %arg0, %c0_i32, %c0_i32_0 : i32, i32, i32
  }
}

</mosaic_0001>

<bundles_post_ra>
// kernel: tpu_custom_call.1
= control target key start
LH: loop header
LB: loop body
LE: loop exit
PB: predicated region body
PF: predicated region fallthrough
CT: control target
= control target key end

     0   :  { %s5024_s0 = inlined_call_operand.vmem [shape: f32[4,8,32], index: 0, kind: input, shape index: {}]   ;;  %s5025_s1 = inlined_call_operand.hbm [shape: f32[2,1,32], index: 1, kind: input, shape index: {}]   ;;  %s5026_s2 = inlined_call_operand.vmem [shape: f32[2,1,32], index: 2, kind: input, shape index: {}]   ;;  %s5027_s3 = inlined_call_operand.vmem [shape: bf16[2,32,96], index: 3, kind: input, shape index: {}]   ;;  %s5028_s4 = inlined_call_operand.vmem [shape: f32[2,1,96], index: 4, kind: input, shape index: {}]   ;;  %s5029_s5 = inlined_call_operand.vmem [shape: bf16[2,32,32], index: 5, kind: input, shape index: {}]   ;;  %s5030_s6 = inlined_call_operand.vmem [shape: f32[2,1,32], index: 6, kind: input, shape index: {}]   ;;  %s5031_s7 = inlined_call_operand.vmem [shape: f32[2,1,32], index: 7, kind: input, shape index: {}]   ;;  %s5032_s8 = inlined_call_operand.vmem [shape: f32[2,1,32], index: 8, kind: input, shape index: {}]   ;;  %s5033_s9 = inlined_call_operand.hbm [shape: bf16[2,32,64], index: 9, kind: input, shape index: {}]   ;;  %s5034_s10 = inlined_call_operand.vmem [shape: f32[2,1,64], index: 10, kind: input, shape index: {}]   ;;  %s5035_s11 = inlined_call_operand.vmem [shape: bf16[2,64,32], index: 11, kind: input, shape index: {}]   ;;  %s5036_s12 = inlined_call_operand.vmem [shape: f32[2,1,32], index: 12, kind: input, shape index: {}]   ;;  %s5037_s13 = inlined_call_operand.vmem [shape: f32[1,32], index: 13, kind: input, shape index: {}]   ;;  %s5038_s14 = inlined_call_operand.vmem [shape: f32[1,32], index: 14, kind: input, shape index: {}]   ;;  %s5039_s15 = inlined_call_operand.hbm [shape: f32[4,8,32], index: 15, kind: output, shape index: {}]  }
   0x1   :  { %5058 = sst [smem:[#allocation27_spill]] %s5024_s0 }
   0x2   :  { %5059 = sst [smem:[#allocation28_spill]] %s5025_s1 }
   0x3   :  { %5060 = sst [smem:[#allocation29_spill]] %s5027_s3 }
   0x4   :  { %5061 = sst [smem:[#allocation30_spill]] %s5029_s5 }
   0x5   :  { %5062 = sst [smem:[#allocation31_spill]] %s5033_s9 }
   0x6   :  { %5063 = sst [smem:[#allocation32_spill]] %s5034_s10 }
   0x7   :  { %5064 = sst [smem:[#allocation33_spill]] %s5035_s11 }
   0x8   :  { %5065 = sst [smem:[#allocation34_spill]] %s5036_s12 }
   0x9   :  { %5066 = sst [smem:[#allocation35_spill]] %s5037_s13 }
   0xa   :  { %5067 = sst [smem:[#allocation36_spill]] %s5038_s14 }
   0xb   :  { %5068 = sst [smem:[#allocation37_spill]] %s5039_s15 }
   0xc   :  { %20 = vsyncpa [#allocation3], 0 }
   0xd   :  { %22 = vsyncpa [#allocation3 + $0x1], 0 }
   0xe   :  { %23 = vsyncpa [#allocation6], 0 }
   0xf   :  { %25 = vsyncpa [#allocation6 + $0x1], 0 }
  0x10   :  { %26 = vsyncpa [#allocation4], 0 }
  0x11   :  { %28 = vsyncpa [#allocation4 + $0x1], 0  ;;  %s4227_s18 = smov 0   ;;  %s4229_s19 = smov 0  }
  0x12   :  { %s4231_s20 = smov 0   ;;  %s4233_s21 = smov 0  }
  0x13   :  { %s4235_s22 = smov 0   ;;  %s4237_s23 = smov 0  }
  0x14   :  { %s4239_s24 = smov 0   ;;  %s4241_s25 = smov 0  }
  0x15   :  { %s4243_s26 = smov 0   ;;  %s4245_s27 = smov 0  }
  0x16   :  { %s4247_s28 = smov 0  }
  0x17 LB: > { %5069 = sst [smem:[#allocation11_spill]] %s4087_s18  ;;  %s3484_s29 = sadd.s32 4294967295, %s4127_s28   ;;  %s4127_s28 = sphi %s4247_s28, %s34_s28   ;;  %s4123_s27 = sphi %s4245_s27, %s5126_s27   ;;  %s4119_s26 = sphi %s4243_s26, %s5125_s26   ;;  %s4115_s25 = sphi %s4241_s25, %s5124_s25   ;;  %s4111_s24 = sphi %s4239_s24, %s5123_s24   ;;  %s4107_s23 = sphi %s4237_s23, %s5122_s23   ;;  %s4103_s22 = sphi %s4235_s22, %s5121_s22   ;;  %s4099_s21 = sphi %s4233_s21, %s5120_s21   ;;  %s4095_s20 = sphi %s4231_s20, %s5119_s20   ;;  %s4091_s19 = sphi %s4229_s19, %s5118_s19   ;;  %s4087_s18 = sphi %s4227_s18, %s5117_s18  }
  0x18   : > { %5070 = sst [smem:[#allocation12_spill]] %s4091_s19  ;;  %s3485_s30 = sadd.s32 4294967294, %s4127_s28  }
  0x19   : > { %5071 = sst [smem:[#allocation13_spill]] %s4095_s20  ;;  %s43_s16 = sadd.s32 1, %s4119_s26 }
  0x1a   : > { %5072 = sst [smem:[#allocation14_spill]] %s4103_s22  ;;  %s46_s17 = sadd.s32 1, %s4123_s27 }
  0x1b   : > { %5073 = sst [smem:[#allocation15_spill]] %s4107_s23  ;;  %p44_p0 = scmp.ge.s32.totalorder %s43_s16, 2 }
  0x1c   : > { %5074 = sst [smem:[#allocation16_spill]] %s4115_s25  ;;  %s79_s15 = sadd.s32 1, %s4107_s23 }
  0x1d   : > { %5075 = sst [smem:[#allocation17_spill]] %s4119_s26  ;;  %p86_p1 = scmp.ne.s32.totalorder %s4107_s23, %s4103_s22 }
  0x1e   : > { %5076 = sst [smem:[#allocation18_spill]] %s4123_s27  ;;  %p87_p2 = scmp.eq.s32.totalorder %s4127_s28, 0 }
  0x1f   : > { %5077 = sst [smem:[#allocation19_spill]] %s4127_s28  ;;  %s5128_s16 = smov (%p44_p0, %s43_s16), 0 }
  0x20   : > { %5078 = sst [smem:[#allocation20_spill]] %s5128_s16  ;;  %s5130_s17 = smov (!%p44_p0, %s46_s17), %s4123_s27 }
  0x21   : > { %s76_s14 = ssub.s32 %s4119_s26, %s5128_s16  ;;  %p4293_p3 = por %p87_p2, %p86_p1 }
  0x22   : > { %p48_p4 = scmp.ge.s32.totalorder %s5130_s17, 2  ;;  %p77_p5 = scmp.eq.s32.totalorder %s76_s14, 0 }
  0x23   : > { %p92_p6 = scmp.ne.s32.totalorder %s4103_s22, %s4099_s21  ;;  %p93_p7 = scmp.eq.s32.totalorder %s3484_s29, 0 }
  0x24   : > { %s5132_s17 = smov (%p48_p4, %s5130_s17), 0  ;;  %s433_s10 = sadd.s32 1, %s4095_s20 }
  0x25   : > { %5080 = sst [smem:[#allocation21_spill]] %s5132_s17  ;;  %p4303_p8 = por %p93_p7, %p92_p6 }
  0x26   : > { %s4301_s11 = scalar_select %p77_p5, %s4107_s23, %s79_s15  }
  0x27   : > { %s430_s12 = ssub.s32 %s4123_s27, %s5132_s17  ;;  %p443_p10 = scmp.ne.s32.totalorder %s4095_s20, %s4091_s19 }
  0x28   : > { %5081 = sst [smem:[#allocation22_spill]] %s4301_s11  ;;  %p431_p9 = scmp.eq.s32.totalorder %s430_s12, 0 }
  0x29   : > { %p444_p11 = scmp.eq.s32.totalorder %s3484_s29, 3  ;;  %p449_p13 = scmp.ne.s32.totalorder %s4091_s19, %s4087_s18 }
  0x2a   : > { %s4313_s14 = scalar_select %p431_p9, %s4095_s20, %s433_s10  }
  0x2b   : > { %p4315_p12 = por %p444_p11, %p443_p10  ;;  %p450_p0 = scmp.eq.s32.totalorder %s3485_s30, 3 }
  0x2c   : > { %5083 = sst [smem:[#allocation23_spill]] %s4313_s14  ;;  %p3767_p1 = scmp.lt.s32.totalorder %s4127_s28, 4 }
  0x2d   : > { %s5084_s21 = scalar_select %p4315_p12, 1, 0 }
  0x2e   : > { %s4323_s15 = sand.u32 1, %s4107_s23   ;;  %p4325_p2 = por %p450_p0, %p449_p13 }
  0x2f   : > { %5085 = sst [smem:[#allocation24_spill]] %s5084_s21  ;;  %s3488_s17 = sshll.u32 %s4119_s26, 4 }
  0x30   : > { %s5086_s12 = scalar_select %p4325_p2, 1, 0 }
  0x31   : > { %s5088_s1 = sld [smem:[#allocation28_spill]]  ;;  %s488_s11 = scalar_lea.vmem [#allocation2], %s4323_s15 }
  0x32   : > { %5087 = sst [smem:[#allocation25_spill]] %s5086_s12  ;;  %s495_s14 = sshll.u32 %s488_s11, 4  ;;  %s496_s14 = int_to_ptr.vmem [resolvable:$true] %s495_s14 }
  0x33   : > { %p4336_p4 = pnand %p3767_p1, %p4293_p3  ;;  %p3492_p5 = scmp.ge.s32.totalorder %s4127_s28, 1 }
  0x34   : > { %p587_p6 = scmp.lt.s32.totalorder %s4127_s28, 5  ;;  %s486_s23 = scalar_lea.sflag [#allocation3], %s4323_s15 }
  0x35   : > { %p3949_p7 = pneg %p4336_p4  ;;  %s3960_s20 = scalar_lea.vmem %s496_s14, 16 }
  0x36   : > { %p3961_p9 = scmp.ne.s32.totalorder %s496_s14, %s3960_s20  ;;  %s4129_s11 = smov [#allocation2]  }
  0x37   : > { %s493_s10 = scalar_lea.hbm %s5088_s1, %s3488_s17  ;;  %s3965_s27 = sshll.u32 %s4129_s11, 4  ;;  %s3966_s27 = int_to_ptr.vmem [resolvable:$false] %s3965_s27 }
  0x38   : > { %p3963_p10 = pnand %p3961_p9, %p3949_p7  ;;  %s3967_s13 = scalar_lea.vmem %s3966_s27, 32 }
  0x39   : > { %p3968_p3 = scmp.lt.s32.totalorder %s496_s14, %s3966_s27  ;;  %p3969_p13 = scmp.lt.s32.totalorder %s3967_s13, %s3960_s20 }
  0x3a   : > { %p3964_p11 = pneg %p3963_p10 }
  0x3b   : > { %p3970_p0 = por %p3969_p13, %p3968_p3 }
  0x3d   : > { %p3971_p1 = pnand %p3970_p0, %p3964_p11 }
  0x3f   : > { %3974 = shalt.err (!%p3971_p1)
}
  0x40   : > { %3759 = dma.hbm_to_vmem [thread:$0]  (!%p4336_p4), %s493_s10, 16, %s496_s14, %s486_s23  }
  0x41   : > { %p4354_p9 = pnand %p3492_p5, %p587_p6  ;;  %s3489_s29 = sshll.u32 %s4323_s15, 4 }
  0x42   : > { %s3567_s20 = sshll.u32 %s4119_s26, 8  ;;  %s5091_s9 = sld [smem:[#allocation31_spill]] }
  0x43   : > { %s552_s1 = scalar_lea.vmem [#allocation5], %s3489_s29  ;;  %s549_s18 = scalar_lea.sflag [#allocation6], %s4323_s15 }
  0x44   : > { %s559_s12 = sshll.u32 %s552_s1, 4  ;;  %s4130_s23 = smov [#allocation5]   ;;  %s560_s12 = int_to_ptr.vmem [resolvable:$true] %s559_s12 }
  0x45   : > { %s3988_s21 = scalar_lea.vmem %s560_s12, 256  ;;  %s3993_s14 = sshll.u32 %s4130_s23, 4  ;;  %s3994_s14 = int_to_ptr.vmem [resolvable:$false] %s3993_s14 }
  0x46   : > { %p3989_p10 = scmp.ne.s32.totalorder %s560_s12, %s3988_s21  ;;  %s3995_s10 = scalar_lea.vmem %s3994_s14, 512 }
  0x47   : > { %p3996_p5 = scmp.lt.s32.totalorder %s560_s12, %s3994_s14  ;;  %p3997_p6 = scmp.lt.s32.totalorder %s3995_s10, %s3988_s21 }
  0x48   : > { %s558_s13 = scalar_lea.hbm %s5091_s9, %s3567_s20  ;;  %p3991_p11 = pnand %p3989_p10, %p3949_p7 }
  0x49   : > { %p3998_p13 = por %p3997_p6, %p3996_p5 }
  0x4a   : > { %p3992_p3 = pneg %p3991_p11 }
  0x4c   : > { %p3999_p0 = pnand %p3998_p13, %p3992_p3 }
  0x4e   : > { %4002 = shalt.err (!%p3999_p0)
}
  0x4f   : > { %s4131_s20 = smov 64   ;;  %s4132_s1 = smov 4  }
  0x50   : > { %3762 = dma.hbm_to_vmem [thread:$0]  (!%p4336_p4), %s558_s13, 256, %s560_s12, %s549_s18, %s4131_s20, %s4131_s20, %s4132_s1  }
  0x51   : > { %591 = sbr.rel (%p4354_p9) target bundleno = 3097 (0xc19), region = 80 }
  0x56   : > { %s4372_s15 = sand.u32 1, %s4103_s22  }
  0x57   : > { %s594_s29 = scalar_lea.sflag [#allocation3], %s4372_s15 }
  0x58   : > { %4074 = dma.done.wait (%p4303_p8), %s594_s29, 16  }
  0x59   : > { %4076 = vsyncadd (%p4303_p8), %s594_s29, 4294967280  ;;  %s3493_s18 = sshll.u32 %s4372_s15, 4  ;;  %s602_s21 = scalar_lea.sflag [#allocation6], %s4372_s15 }
  0x5a   : > { %s4382_s12 = scalar_lea.vmem [#allocation5], %s3493_s18 }
  0x5b   : > { %5092 = sst [smem:[#allocation26_spill]] %s4382_s12 }
  0x5c   : > { %4078 = dma.done.wait (%p4303_p8), %s602_s21, 256  }
  0x5d   : > { %4080 = vsyncadd (%p4303_p8), %s602_s21, 4294967040  ;;  %s5050_s30 = sand.u32 1, %s4091_s19   ;;  %s3495_s17 = sshll.u32 %s4115_s25, 1 }
  0x5e   : > { %s3494_s27 = sshll.u32 %s5050_s30, 4  ;;  %p698_p4 = scmp.lt.s32.totalorder %s3495_s17, 3 }
  0x5f   : > { %p703_p7 = scmp.lt.s32.totalorder %s4111_s24, 1  ;;  %s5093_s0 = sld [smem:[#allocation27_spill]] }
  0x60   : > { %s5134_s17 = smov (!%p698_p4, %s3495_s17), 3  ;;  %s5094_s3 = sld [smem:[#allocation29_spill]] }
  0x61   : > { %s4394_s13 = scalar_select %p703_p7, %s4111_s24, 1 }
  0x62   : > { %s3496_s16 = sshll.u32 %s5134_s17, 3  ;;  %s5095_s5 = sld [smem:[#allocation30_spill]] }
  0x63   : > { %s3568_s18 = sshll.u32 %s4394_s13, 4  ;;  %s724_s29 = scalar_lea.vmem %s5031_s7, %s4394_s13 }
  0x64   : > { %s727_s11 = scalar_lea.vmem %s5032_s8, %s4394_s13  ;;  %s3570_s25 = sshll.u32 %s4394_s13, 5 }
  0x65   : > { %s701_s10 = scalar_lea.vmem %s5093_s0, %s3496_s16  ;;  %s5096_s0 = sld [smem:[#allocation32_spill]] }
  0x66   : > { %s4411_s22 = scalar_lea.vmem %s5094_s3, %s3568_s18  ;;  %s5097_s17 = sld [smem:[#allocation34_spill]] }
  0x67   : > { %s5098_s23 = sld [smem:[#allocation33_spill]]  ;;  %s4444_s20 = scalar_lea.vmem [#allocation7], %s3494_s27 }
  0x68   : > { %s4416_s19 = scalar_lea.vmem %s5095_s5, %s3568_s18  ;;  %p3503_p8 = scmp.ne.s32.totalorder %s4111_s24, 0 }
  0x6a   : > { %744 = sbr.rel (%p3503_p8) target bundleno = 113 (0x71), region = 92 }
  0x6b   : > { %s730_s3 = scalar_lea.vmem %s5096_s0, %s4394_s13 }
  0x6c   : > { %s738_s5 = scalar_lea.vmem %s5097_s17, %s4394_s13 }
  0x6d   : > { %s4442_s14 = scalar_lea.vmem %s5098_s23, %s3570_s25 }
  0x6f   : > { %v745_v0 = vld [vmem:[%s701_s10] sm:$0xff]  ;;  %vm747_vm0 = vcmask 261120   ;;  %v746_v1 = vld [vmem:[%s701_s10 + $0x8] sm:$0xff] }
  0x70   : > { %748 = vst.msk [vmem:[%s4444_s20] sm:$0xff] %vm747_vm0, %v745_v0  ;;  %749 = vst.msk [vmem:[%s4444_s20 + $0x8] sm:$0xff] %vm747_vm0, %v746_v1 }
  0x71 PF: > { %vm754_vm1 = vcmask 261120   ;;  %v3887_v16 = vld [vmem:[%s4411_s22 + $0x8] sm:$0xff]   ;;  %v4133_v17 = vmov 0.0   ;;  %vm4134_vm2 = vmmov 0   ;;  %v3888_v18 = vld [vmem:[%s4411_s22] sm:$0xff]   ;;  %s5099_s0 = scalar_lea.vmem [#allocation2], %s4372_s15  ;;  %s5100_s12 = scalar_lea.vmem %s5026_s2, %s4394_s13  ;;  %v891_v51 = vlaneseq }
  0x72   : > { %3618 = vmatprep.subr.bf16.mxu0 %v4133_v17  ;;  %3622 = vmatprep.mubr.msk.bf16.mxu0 %vm4134_vm2, %v4133_v17  ;;  %v3504_v27 = vld [vmem:[%s5099_s0] ss:$0 sm:$0xff]  ;;  %s5101_s10 = scalar_lea.vmem %s5028_s4, %s4394_s13  ;;  %s4135_s1 = smov 112   ;;  %v4139_v49 = vmov 1983009808   ;;  %vm1766_vm3 = vcmask 64512  }
  0x73   : > { %3619 = vmatpush3.bf16.msra.mxu0 %v3887_v16  ;;  %3626 = vmatprep.subr.bf16.mxu1 %v4133_v17  ;;  %v3505_v31 = vld [vmem:[%s5100_s12] ss:$0 sm:$0xff]  ;;  %s4136_s30 = smov 120   ;;  %s4137_s21 = smov 104   ;;  %v889_v50 = vunpack.c.l.s4 %v4139_v49  ;;  %v892_v53 = vshrl.u32 %v891_v51, 7  ;;  %vm2242_vm4 = vcmask 1043456  }
  0x74   : > { %3620 = vmatprep.subr.bf16.mxu0 %v4133_v17  ;;  %3628 = vmatprep.mubr.msk.bf16.mxu1 %vm4134_vm2, %v4133_v17  ;;  %v3506_v36 = vld [vmem:[%s5101_s10] ss:$0 sm:$0xff]  ;;  %s4138_s9 = smov 96   ;;  %v4140_v54 = vmov 1934713408   ;;  %s4141_s26 = smov 64  }
  0x75   : > { %v890_v52 = vunpack.c.0.s8 %v889_v50  ;;  %v921_v55 = vunpack.c.l.s4 %v4140_v54  ;;  %s4142_s28 = smov 16   ;;  %s4144_s18 = smov 24   ;;  %vm2906_vm5 = vcmask 130048   ;;  %vm2909_vm6 = vcmask 195584  }
  0x76   : > { %s5102_s23 = scalar_lea.vmem %s5030_s6, %s4394_s13  ;;  %s5103_s0 = sld [smem:[#allocation26_spill]]  ;;  %vm3152_vm7 = vcmask 523264  }
  0x77   : > { %v750_v2 = vld [vmem:[%s4444_s20] sm:$0xff]  ;;  %v751_v3 = vld [vmem:[%s4444_s20 + $0x8] sm:$0xff]  ;;  %3621 = vmatpush3.bf16.msra.mxu0 %v3888_v18  ;;  %v4514_v58 = vsub.s32 %v890_v52, %v892_v53  ;;  %v922_v61 = vunpack.c.0.s8 %v921_v55  ;;  %p3558_p1 = scmp.ge.s32.totalorder %s4111_s24, 1 }
  0x78   : > { %v755_v4 = vsel %vm754_vm1, %v750_v2, 0.0  ;;  %v758_v5 = vsel %vm754_vm1, %v751_v3, 0.0  ;;  %3632 = vmatprep.subr.bf16.mxu0 %v4133_v17 }
  0x79   : > { %756 = vadd.xlane.f32.xlu0 %v755_v4 }
  0x7d   : > { %759 = vadd.xlane.f32.xlu0 %v758_v5 }
 0x102   : > { %v757_v6 = vpop.xlane.xlu0 %756 }
 0x103   : > { %v762_v7 = vmul.f32 0.03125, %v757_v6 }
 0x105   : > { %v764_v8 = vsub.f32 %v750_v2, %v762_v7  ;;  %v4524_v2 = vsub.s32 %v922_v61, %v892_v53 }
 0x106   : > { %v760_v9 = vpop.xlane.xlu0 %759 }
 0x107   : > { %v763_v10 = vmul.f32 0.03125, %v760_v9  ;;  %v766_v11 = vmul.f32 %v764_v8, %v764_v8 }
 0x109   : > { %v765_v12 = vsub.f32 %v751_v3, %v763_v10  ;;  %v768_v13 = vsel %vm754_vm1, %v766_v11, 0.0 }
 0x10a   : > { %769 = vadd.xlane.f32.xlu1 %v768_v13 }
 0x10b   : > { %v767_v14 = vmul.f32 %v765_v12, %v765_v12 }
 0x10d   : > { %v771_v15 = vsel %vm754_vm1, %v767_v14, 0.0 }
 0x10e   : > { %772 = vadd.xlane.f32.xlu1 %v771_v15 }
 0x193   : > { %v770_v19 = vpop.xlane.xlu1 %769 }
 0x194   : > { %v774_v20 = vmul.f32 0.03125, %v770_v19 }
 0x196   : > { %v776_v21 = vadd.f32 1e-05, %v774_v20 }
 0x197   : > { %v773_v22 = vpop.xlane.xlu1 %772 }
 0x198   : > { %3897 = vrsqrt.f32 %v776_v21  ;;  %v775_v23 = vmul.f32 0.03125, %v773_v22 }
 0x19a   : > { %v777_v24 = vadd.f32 1e-05, %v775_v23 }
 0x19c   : > { %3899 = vrsqrt.f32 %v777_v24 }
 0x1a5   : > { %v3898_v25 = vpop.eup %3897 }
 0x1a6   : > { %v780_v26 = vmul.f32 %v3898_v25, %v764_v8 }
 0x1a8   : > { %v788_v30 = vmul.f32 %v3504_v27, %v780_v26 }
 0x1a9   : > { %v3900_v28 = vpop.eup %3899 }
 0x1aa   : > { %v781_v29 = vmul.f32 %v3900_v28, %v765_v12  ;;  %v796_v33 = vadd.f32 %v3505_v31, %v788_v30 }
 0x1ac   : > { %v789_v32 = vmul.f32 %v3504_v27, %v781_v29 }
 0x1ae   : > { %v797_v34 = vadd.f32 %v3505_v31, %v789_v32 }
 0x1b0   : > { %v798_v35 = vpack.c.bf16 %v797_v34, %v796_v33 }
 0x1b2   : > { %3623 = vmatmul.mubr.msk.bf16.vlgmr.msra.gmra.mxu0 %vm754_vm1, %v798_v35 }
 0x1b3   : > { %3634 = vmatprep.mubr.msk.bf16.mxu0 %vm4134_vm2, %v4133_v17 }
 0x272   : > { %v859_v37 = vpop.f32.mrf.mxu0 }
 0x273   : > { %v4480_v38 = vadd.f32 %v3506_v36, %v859_v37 }
 0x274   : > { %v3624_v39 = vpop.f32.mrf.mxu0 }
 0x275   : > { %874 = vrot.lane.b32.xlu1 %v4480_v38, %s4135_s1  ;;  %868 = vrot.lane.b32.xlu0 %v4480_v38, %s4136_s30 }
 0x276   : > { %v862_v40 = vpop.f32.mrf.mxu0 }
 0x277   : > { %v4484_v41 = vadd.f32 %v3506_v36, %v862_v40 }
 0x278   : > { %v3625_v42 = vpop.f32.mrf.mxu0 }
 0x279   : > { %880 = vrot.lane.b32.xlu1 %v4480_v38, %s4137_s21  ;;  %876 = vrot.lane.b32.xlu0 %v4484_v41, %s4135_s1 }
 0x27d   : > { %1158 = vrot.lane.b32.xlu0 %v4480_v38, %s4138_s9  ;;  %870 = vrot.lane.b32.xlu1 %v4484_v41, %s4136_s30 }
 0x281   : > { %882 = vrot.lane.b32.xlu1 %v4484_v41, %s4137_s21 }
 0x2e7   : > { %v4491_v43 = vpop.permute.xlu1 %874  ;;  %v4493_v44 = vpop.permute.xlu0 %868 }
 0x2e8   : > { %1166 = vrot.lane.b32.xlu0 %v4491_v43, %s4138_s9  ;;  %1162 = vrot.lane.b32.xlu1 %v4493_v44, %s4138_s9  ;;  %v886_v59 = vcombine.low %v4480_v38, %v4491_v43  ;;  %v887_v60 = vcombine.high %v4480_v38, %v4491_v43 }
 0x2ea   : > { %v894_v0 = vrot.slane %v886_v59, %v4514_v58  ;;  %v901_v1 = vrot.slane %v887_v60, %v4514_v58 }
 0x2eb   : > { %v4497_v45 = vpop.permute.xlu1 %880  ;;  %v4501_v46 = vpop.permute.xlu0 %876 }
 0x2ec   : > { %1160 = vrot.lane.b32.xlu0 %v4484_v41, %s4138_s9  ;;  %1170 = vrot.lane.b32.xlu1 %v4497_v45, %s4138_s9  ;;  %v902_v56 = vcombine.low %v4493_v44, %v4497_v45  ;;  %v903_v57 = vcombine.high %v4493_v44, %v4497_v45  ;;  %v954_v19 = vcombine.low %v4484_v41, %v4501_v46 }
 0x2ed   : > { %v955_v20 = vcombine.high %v4484_v41, %v4501_v46 }
 0x2ee   : > { %v910_v62 = vrot.slane %v902_v56, %v4514_v58  ;;  %v917_v63 = vrot.slane %v903_v57, %v4514_v58  ;;  %v962_v33 = vrot.slane %v954_v19, %v4514_v58 }
 0x2ef   : > { %v4503_v47 = vpop.permute.xlu1 %870  ;;  %v1159_v7 = vpop.permute.xlu0 %1158  ;;  %v4552_v34 = vrot.slane %v955_v20, %v4514_v58 }
 0x2f0   : > { %1168 = vrot.lane.b32.xlu0 %v4501_v46, %s4138_s9  ;;  %1164 = vrot.lane.b32.xlu1 %v4503_v47, %s4138_s9  ;;  %v918_v3 = vcombine.low %v894_v0, %v910_v62  ;;  %v919_v4 = vcombine.high %v894_v0, %v910_v62  ;;  %v934_v5 = vcombine.low %v901_v1, %v917_v63 }
 0x2f1   : > { %v935_v6 = vcombine.high %v901_v1, %v917_v63 }
 0x2f2   : > { %v926_v8 = vrot.slane %v918_v3, %v4524_v2  ;;  %v933_v9 = vrot.slane %v919_v4, %v4524_v2  ;;  %v942_v10 = vrot.slane %v934_v5, %v4524_v2 }
 0x2f3   : > { %v4507_v48 = vpop.permute.xlu1 %882  ;;  %v949_v11 = vrot.slane %v935_v6, %v4524_v2 }
 0x2f4   : > { %1172 = vrot.lane.b32.xlu1 %v4507_v48, %s4138_s9  ;;  %v1022_v14 = vcombine.low %v926_v8, %v933_v9  ;;  %v3510_v15 = vcombine.high %v926_v8, %v933_v9  ;;  %v970_v21 = vcombine.low %v4503_v47, %v4507_v48  ;;  %v971_v22 = vcombine.high %v4503_v47, %v4507_v48 }
 0x2f5   : > { %v1038_v16 = vcombine.low %v942_v10, %v949_v11  ;;  %v3511_v18 = vcombine.high %v942_v10, %v949_v11 }
 0x2f6   : > { %v4539_v27 = vrot.slane %v1022_v14, %v4514_v58  ;;  %v4542_v28 = vrot.slane %v3510_v15, %v4514_v58  ;;  %v978_v35 = vrot.slane %v970_v21, %v4514_v58  ;;  %v4556_v36 = vrot.slane %v971_v22, %v4514_v58 }
 0x2f7   : > { %v4545_v29 = vrot.slane %v1038_v16, %v4514_v58  ;;  %v4548_v30 = vrot.slane %v3511_v18, %v4514_v58 }
 0x2f8   : > { %v1054_v50 = vcombine.low %v4539_v27, %v4542_v28  ;;  %v1055_v51 = vcombine.high %v4539_v27, %v4542_v28  ;;  %v986_v60 = vcombine.low %v962_v33, %v978_v35  ;;  %v987_v61 = vcombine.high %v962_v33, %v978_v35 }
 0x2f9   : > { %v1070_v52 = vcombine.low %v4545_v29, %v4548_v30  ;;  %v1071_v53 = vcombine.high %v4545_v29, %v4548_v30  ;;  %v1002_v62 = vcombine.low %v4552_v34, %v4556_v36  ;;  %v1003_v63 = vcombine.high %v4552_v34, %v4556_v36 }
 0x2fa   : > { %v1062_v8 = vrot.slane %v1054_v50, %v4524_v2  ;;  %v4581_v14 = vrot.slane %v986_v60, %v4524_v2  ;;  %v4584_v15 = vrot.slane %v987_v61, %v4524_v2 }
 0x2fb   : > { %v1078_v9 = vrot.slane %v1070_v52, %v4524_v2 }
 0x35a   : > { %v1167_v12 = vpop.permute.xlu0 %1166  ;;  %v1163_v13 = vpop.permute.xlu1 %1162 }
 0x35b   : > { %v1182_v23 = vcombine.low %v1159_v7, %v1167_v12  ;;  %v1183_v24 = vcombine.high %v1159_v7, %v1167_v12 }
 0x35d   : > { %v1190_v37 = vrot.slane %v1182_v23, %v4514_v58  ;;  %v1197_v39 = vrot.slane %v1183_v24, %v4514_v58 }
 0x35e   : > { %v1161_v25 = vpop.permute.xlu0 %1160  ;;  %v1171_v26 = vpop.permute.xlu1 %1170 }
 0x35f   : > { %v1198_v31 = vcombine.low %v1163_v13, %v1171_v26  ;;  %v1199_v32 = vcombine.high %v1163_v13, %v1171_v26 }
 0x361   : > { %v1206_v40 = vrot.slane %v1198_v31, %v4514_v58  ;;  %v1213_v42 = vrot.slane %v1199_v32, %v4514_v58 }
 0x362   : > { %v1165_v49 = vpop.permute.xlu1 %1164  ;;  %v1169_v59 = vpop.permute.xlu0 %1168 }
 0x363   : > { %v1214_v54 = vcombine.low %v1190_v37, %v1206_v40  ;;  %v1215_v55 = vcombine.high %v1190_v37, %v1206_v40  ;;  %v1230_v56 = vcombine.low %v1197_v39, %v1213_v42  ;;  %v1231_v57 = vcombine.high %v1197_v39, %v1213_v42 }
 0x364   : > { %v1250_v5 = vcombine.low %v1161_v25, %v1169_v59  ;;  %v1251_v6 = vcombine.high %v1161_v25, %v1169_v59  ;;  %v1017_v59 = vrot.slane %v1003_v63, %v4524_v2 }
 0x365   : > { %v1222_v0 = vrot.slane %v1214_v54, %v4524_v2  ;;  %v1229_v1 = vrot.slane %v1215_v55, %v4524_v2  ;;  %v1238_v3 = vrot.slane %v1230_v56, %v4524_v2  ;;  %v1245_v4 = vrot.slane %v1231_v57, %v4524_v2 }
 0x366   : > { %v1173_v7 = vpop.permute.xlu1 %1172  ;;  %v1258_v23 = vrot.slane %v1250_v5, %v4514_v58  ;;  %v1265_v24 = vrot.slane %v1251_v6, %v4514_v58  ;;  %v1010_v57 = vrot.slane %v1002_v62, %v4524_v2 }
 0x367   : > { %v1318_v10 = vcombine.low %v1222_v0, %v1229_v1  ;;  %v3514_v11 = vcombine.high %v1222_v0, %v1229_v1  ;;  %v1334_v12 = vcombine.low %v1238_v3, %v1245_v4  ;;  %v3515_v13 = vcombine.high %v1238_v3, %v1245_v4 }
 0x368   : > { %v1266_v16 = vcombine.low %v1165_v49, %v1173_v7  ;;  %v1267_v18 = vcombine.high %v1165_v49, %v1173_v7  ;;  %v1086_v7 = vcombine.low %v1062_v8, %v1078_v9 }
 0x369   : > { %v1325_v19 = vrot.slane %v1318_v10, %v4514_v58  ;;  %v1333_v20 = vrot.slane %v3514_v11, %v4514_v58  ;;  %v1341_v21 = vrot.slane %v1334_v12, %v4514_v58  ;;  %v1349_v22 = vrot.slane %v3515_v13, %v4514_v58 }
 0x36a   : > { %v1274_v25 = vrot.slane %v1266_v16, %v4514_v58  ;;  %v1281_v26 = vrot.slane %v1267_v18, %v4514_v58  ;;  %v1087_v18 = vcombine.high %v1062_v8, %v1078_v9 }
 0x36b   : > { %v1350_v31 = vcombine.low %v1325_v19, %v1333_v20  ;;  %v1366_v32 = vcombine.low %v1341_v21, %v1349_v22  ;;  %v1351_v33 = vcombine.high %v1325_v19, %v1333_v20  ;;  %v1367_v34 = vcombine.high %v1341_v21, %v1349_v22 }
 0x36c   : > { %v1282_v35 = vcombine.low %v1258_v23, %v1274_v25  ;;  %v1283_v36 = vcombine.high %v1258_v23, %v1274_v25  ;;  %v1298_v37 = vcombine.low %v1265_v24, %v1281_v26  ;;  %v1299_v39 = vcombine.high %v1265_v24, %v1281_v26 }
 0x36d   : > { %v1358_v40 = vrot.slane %v1350_v31, %v4524_v2  ;;  %v1374_v42 = vrot.slane %v1366_v32, %v4524_v2  ;;  %v1365_v49 = vrot.slane %v1351_v33, %v4524_v2  ;;  %v1381_v50 = vrot.slane %v1367_v34, %v4524_v2 }
 0x36e   : > { %v1290_v52 = vrot.slane %v1282_v35, %v4524_v2  ;;  %v1297_v54 = vrot.slane %v1283_v36, %v4524_v2  ;;  %v1306_v55 = vrot.slane %v1298_v37, %v4524_v2  ;;  %v1313_v56 = vrot.slane %v1299_v39, %v4524_v2 }
 0x36f   : > { %v1382_v60 = vcombine.low %v1358_v40, %v1374_v42  ;;  %v1383_v61 = vcombine.high %v1358_v40, %v1374_v42  ;;  %v1384_v10 = vcombine.low %v1365_v49, %v1381_v50  ;;  %v1385_v19 = vcombine.high %v1365_v49, %v1381_v50 }
 0x370   : > { %v1386_v0 = vcombine.low %v1290_v52, %v1297_v54  ;;  %v3516_v1 = vcombine.high %v1290_v52, %v1297_v54  ;;  %v1402_v3 = vcombine.low %v1306_v55, %v1313_v56  ;;  %v3517_v4 = vcombine.high %v1306_v55, %v1313_v56 }
 0x371   : > { %v1758_v5 = vpack.c.bf16 %v1382_v60, %v1382_v60  ;;  %v1759_v6 = vpack.c.bf16 %v1383_v61, %v1383_v61  ;;  %v1090_v20 = vcombine.low %v4581_v14, %v4584_v15  ;;  %v3512_v23 = vcombine.high %v4581_v14, %v4584_v15 }
 0x372   : > { %v1393_v11 = vrot.slane %v1386_v0, %v4514_v58  ;;  %v1401_v12 = vrot.slane %v3516_v1, %v4514_v58  ;;  %v1409_v13 = vrot.slane %v1402_v3, %v4514_v58  ;;  %v1417_v62 = vrot.slane %v3517_v4, %v4514_v58 }
 0x373   : > { %v1771_v63 = vsel %vm1766_vm3, %v1758_v5, 0  ;;  %v1817_v16 = vsel %vm1766_vm3, %v1759_v6, 0  ;;  %v1106_v24 = vcombine.low %v1010_v57, %v1017_v59  ;;  %v3513_v25 = vcombine.high %v1010_v57, %v1017_v59 }
 0x374   : > { %3627 = vmatpush3.bf16.xpose.msra.mxu1 %v1771_v63  ;;  %3633 = vmatpush3.bf16.xpose.msra.mxu0 %v1817_v16  ;;  %v1418_v21 = vcombine.low %v1393_v11, %v1401_v12  ;;  %v1434_v22 = vcombine.low %v1409_v13, %v1417_v62  ;;  %v1760_v26 = vpack.c.bf16 %v1384_v10, %v1384_v10 }
 0x375   : > { %3638 = vmatprep.subr.bf16.mxu1 %v4133_v17  ;;  %3644 = vmatprep.subr.bf16.mxu0 %v4133_v17  ;;  %v1761_v31 = vpack.c.bf16 %v1385_v19, %v1385_v19  ;;  %v1750_v32 = vpack.c.bf16 %v1086_v7, %v1086_v7  ;;  %v1751_v33 = vpack.c.bf16 %v1087_v18, %v1087_v18 }
 0x376   : > { %v1426_v8 = vrot.slane %v1418_v21, %v4524_v2  ;;  %v1442_v9 = vrot.slane %v1434_v22, %v4524_v2  ;;  %v1069_v34 = vrot.slane %v1055_v51, %v4524_v2  ;;  %v1085_v14 = vrot.slane %v1071_v53, %v4524_v2 }
 0x377   : > { %v1097_v15 = vrot.slane %v1090_v20, %v4514_v58  ;;  %v1105_v35 = vrot.slane %v3512_v23, %v4514_v58  ;;  %v1113_v36 = vrot.slane %v1106_v24, %v4514_v58  ;;  %v1121_v37 = vrot.slane %v3513_v25, %v4514_v58 }
 0x378   : > { %v1863_v39 = vsel %vm1766_vm3, %v1760_v26, 0  ;;  %v1419_v40 = vcombine.high %v1393_v11, %v1401_v12  ;;  %v1909_v27 = vsel %vm1766_vm3, %v1761_v31, 0  ;;  %v1450_v28 = vcombine.low %v1426_v8, %v1442_v9 }
 0x379   : > { %v1451_v29 = vcombine.high %v1426_v8, %v1442_v9  ;;  %v1435_v30 = vcombine.high %v1409_v13, %v1417_v62  ;;  %v1088_v51 = vcombine.low %v1069_v34, %v1085_v14  ;;  %v1089_v53 = vcombine.high %v1069_v34, %v1085_v14 }
 0x37a   : > { %v1122_v42 = vcombine.low %v1097_v15, %v1105_v35  ;;  %v1138_v49 = vcombine.low %v1113_v36, %v1121_v37  ;;  %v1762_v50 = vpack.c.bf16 %v1450_v28, %v1450_v28  ;;  %v1433_v54 = vrot.slane %v1419_v40, %v4524_v2 }
 0x37b   : > { %3629 = vmatmul.mubr.msk.bf16.vlgmr.msra.gmra.mxu1 %vm1766_vm3, %v1750_v32  ;;  %3635 = vmatmul.mubr.msk.bf16.vlgmr.msra.gmra.mxu0 %vm1766_vm3, %v1751_v33  ;;  %v1763_v52 = vpack.c.bf16 %v1451_v29, %v1451_v29  ;;  %v1449_v55 = vrot.slane %v1435_v30, %v4524_v2  ;;  %v1752_v56 = vpack.c.bf16 %v1088_v51, %v1088_v51 }
 0x37c   : > { %3639 = vmatpush3.bf16.xpose.msra.mxu1 %v1863_v39  ;;  %3645 = vmatpush3.bf16.xpose.msra.mxu0 %v1909_v27  ;;  %v1753_v57 = vpack.c.bf16 %v1089_v53, %v1089_v53  ;;  %v1130_v59 = vrot.slane %v1122_v42, %v4524_v2  ;;  %v1146_v60 = vrot.slane %v1138_v49, %v4524_v2  ;;  %v1955_v61 = vsel %vm1766_vm3, %v1762_v50, 0 }
 0x37d   : > { %3640 = vmatprep.mubr.msk.bf16.mxu1 %vm4134_vm2, %v4133_v17  ;;  %3646 = vmatprep.mubr.msk.bf16.mxu0 %vm4134_vm2, %v4133_v17  ;;  %v2001_v0 = vsel %vm1766_vm3, %v1763_v52, 0  ;;  %v1452_v1 = vcombine.low %v1433_v54, %v1449_v55  ;;  %v1453_v3 = vcombine.high %v1433_v54, %v1449_v55  ;;  %v1123_v4 = vcombine.high %v1097_v15, %v1105_v35 }
 0x37e   : > { %3650 = vmatprep.subr.bf16.mxu1 %v4133_v17  ;;  %3656 = vmatprep.subr.bf16.mxu0 %v4133_v17  ;;  %v1154_v5 = vcombine.low %v1130_v59, %v1146_v60  ;;  %v1155_v6 = vcombine.high %v1130_v59, %v1146_v60  ;;  %v1139_v7 = vcombine.high %v1113_v36, %v1121_v37 }
 0x37f   : > { %v1764_v10 = vpack.c.bf16 %v1452_v1, %v1452_v1  ;;  %v1765_v11 = vpack.c.bf16 %v1453_v3, %v1453_v3  ;;  %v1137_v62 = vrot.slane %v1123_v4, %v4524_v2 }
 0x380   : > { %v1754_v12 = vpack.c.bf16 %v1154_v5, %v1154_v5  ;;  %v1755_v13 = vpack.c.bf16 %v1155_v6, %v1155_v6  ;;  %v1153_v63 = vrot.slane %v1139_v7, %v4524_v2 }
 0x381   : > { %v2047_v16 = vsel %vm1766_vm3, %v1764_v10, 0  ;;  %v2093_v18 = vsel %vm1766_vm3, %v1765_v11, 0 }
 0x382   : > { %v1156_v19 = vcombine.low %v1137_v62, %v1153_v63  ;;  %v1157_v20 = vcombine.high %v1137_v62, %v1153_v63 }
 0x383   : > { %3641 = vmatmul.mubr.msk.bf16.vlgmr.msra.gmra.mxu1 %vm1766_vm3, %v1752_v56  ;;  %3647 = vmatmul.mubr.msk.bf16.vlgmr.msra.gmra.mxu0 %vm1766_vm3, %v1753_v57 }
 0x384   : > { %3651 = vmatpush3.bf16.xpose.msra.mxu1 %v1955_v61  ;;  %3657 = vmatpush3.bf16.xpose.msra.mxu0 %v2001_v0  ;;  %v1756_v21 = vpack.c.bf16 %v1156_v19, %v1156_v19  ;;  %v1757_v22 = vpack.c.bf16 %v1157_v20, %v1157_v20 }
 0x385   : > { %3652 = vmatprep.mubr.msk.bf16.mxu1 %vm4134_vm2, %v4133_v17  ;;  %3658 = vmatprep.mubr.msk.bf16.mxu0 %vm4134_vm2, %v4133_v17 }
 0x386   : > { %3662 = vmatprep.subr.bf16.mxu1 %v4133_v17  ;;  %3668 = vmatprep.subr.bf16.mxu0 %v4133_v17 }
 0x38b   : > { %3653 = vmatmul.mubr.msk.bf16.vlgmr.msra.gmra.mxu1 %vm1766_vm3, %v1754_v12  ;;  %3659 = vmatmul.mubr.msk.bf16.vlgmr.msra.gmra.mxu0 %vm1766_vm3, %v1755_v13 }
 0x38c   : > { %3663 = vmatpush3.bf16.xpose.msra.mxu1 %v2047_v16  ;;  %3669 = vmatpush3.bf16.xpose.msra.mxu0 %v2093_v18 }
 0x38d   : > { %3664 = vmatprep.mubr.msk.bf16.mxu1 %vm4134_vm2, %v4133_v17  ;;  %3670 = vmatprep.mubr.msk.bf16.mxu0 %vm4134_vm2, %v4133_v17 }
 0x38e   : > { %3674 = vmatprep.subr.bf16.mxu1 %v4133_v17  ;;  %3680 = vmatprep.subr.bf16.mxu0 %v4133_v17 }
 0x393   : > { %3665 = vmatmul.mubr.msk.bf16.vlgmr.msra.gmra.mxu1 %vm1766_vm3, %v1756_v21  ;;  %3671 = vmatmul.mubr.msk.bf16.vlgmr.msra.gmra.mxu0 %vm1766_vm3, %v1757_v22 }
 0x394   : > { %3676 = vmatprep.mubr.msk.bf16.mxu1 %vm4134_vm2, %v4133_v17  ;;  %3682 = vmatprep.mubr.msk.bf16.mxu0 %vm4134_vm2, %v4133_v17 }
 0x43b   : > { %v1807_v23 = vpop.f32.mrf.mxu1  ;;  %v1853_v24 = vpop.f32.mrf.mxu0 }
 0x43c   : > { %v2135_v25 = vsel %vm1766_vm3, %v1807_v23, -inf  ;;  %v2138_v26 = vsel %vm1766_vm3, %v1853_v24, -inf }
 0x43d   : > { %2136 = vmax.xlane.f32.xlu0 %v2135_v25  ;;  %v3630_v31 = vpop.f32.mrf.mxu1  ;;  %2139 = vmax.xlane.f32.xlu1 %v2138_v26  ;;  %v3636_v8 = vpop.f32.mrf.mxu0 }
 0x43f   : > { %v1810_v9 = vpop.f32.mrf.mxu1  ;;  %v1856_v32 = vpop.f32.mrf.mxu0 }
 0x441   : > { %v3631_v33 = vpop.f32.mrf.mxu1  ;;  %v3637_v34 = vpop.f32.mrf.mxu0 }
 0x443   : > { %v1899_v14 = vpop.f32.mrf.mxu1  ;;  %v1945_v15 = vpop.f32.mrf.mxu0 }
 0x444   : > { %v2141_v35 = vsel %vm1766_vm3, %v1899_v14, -inf  ;;  %v2144_v27 = vsel %vm1766_vm3, %v1945_v15, -inf }
 0x445   : > { %2142 = vmax.xlane.f32.xlu0 %v2141_v35  ;;  %v3642_v36 = vpop.f32.mrf.mxu1  ;;  %v3648_v37 = vpop.f32.mrf.mxu0 }
 0x447   : > { %v1902_v39 = vpop.f32.mrf.mxu1  ;;  %v1948_v40 = vpop.f32.mrf.mxu0 }
 0x449   : > { %v3643_v28 = vpop.f32.mrf.mxu1  ;;  %2145 = vmax.xlane.f32.xlu0 %v2144_v27  ;;  %v3649_v29 = vpop.f32.mrf.mxu0 }
 0x44b   : > { %v1991_v30 = vpop.f32.mrf.mxu1  ;;  %v2037_v51 = vpop.f32.mrf.mxu0 }
 0x44c   : > { %v2147_v53 = vsel %vm1766_vm3, %v1991_v30, -inf  ;;  %v2150_v42 = vsel %vm1766_vm3, %v2037_v51, -inf }
 0x44d   : > { %v3654_v49 = vpop.f32.mrf.mxu1  ;;  %2148 = vmax.xlane.f32.xlu0 %v2147_v53  ;;  %2151 = vmax.xlane.f32.xlu1 %v2150_v42  ;;  %v3660_v50 = vpop.f32.mrf.mxu0 }
 0x44f   : > { %v1994_v52 = vpop.f32.mrf.mxu1  ;;  %v2040_v54 = vpop.f32.mrf.mxu0 }
 0x451   : > { %v3655_v55 = vpop.f32.mrf.mxu1  ;;  %v3661_v56 = vpop.f32.mrf.mxu0 }
 0x453   : > { %v4678_v57 = vpop.f32.mrf.mxu1  ;;  %v4680_v59 = vpop.f32.mrf.mxu0 }
 0x454   : > { %v2153_v60 = vsel %vm1766_vm3, %v4678_v57, -inf  ;;  %v2156_v6 = vsel %vm1766_vm3, %v4680_v59, -inf }
 0x455   : > { %v3666_v61 = vpop.f32.mrf.mxu1  ;;  %2154 = vmax.xlane.f32.xlu0 %v2153_v60  ;;  %v3672_v0 = vpop.f32.mrf.mxu0 }
 0x457   : > { %v2086_v1 = vpop.f32.mrf.mxu1  ;;  %v2132_v3 = vpop.f32.mrf.mxu0 }
 0x459   : > { %v3667_v4 = vpop.f32.mrf.mxu1  ;;  %v3673_v5 = vpop.f32.mrf.mxu0 }
 0x45e   : > { %1458 = vrot.lane.b32.xlu1 %v4493_v44, %s4141_s26 }
 0x462   : > { %1462 = vrot.lane.b32.xlu1 %v4491_v43, %s4141_s26 }
 0x46b   : > { %1454 = vrot.lane.b32.xlu0 %v4480_v38, %s4141_s26 }
 0x486   : > { %2157 = vmax.xlane.f32.xlu1 %v2156_v6 }
 0x497   : > { %1466 = vrot.lane.b32.xlu1 %v4497_v45, %s4141_s26 }
 0x4c6   : > { %v2137_v7 = vpop.xlane.xlu0 %2136  ;;  %v2140_v10 = vpop.xlane.xlu1 %2139 }
 0x4c7   : > { %v2159_v11 = vsub.f32 %v1807_v23, %v2137_v7  ;;  %v2160_v12 = vsub.f32 %v1853_v24, %v2140_v10 }
 0x4c9   : > { %v2167_v13 = vmul.f32 1.442695, %v2159_v11  ;;  %v2169_v62 = vmul.f32 1.442695, %v2160_v12 }
 0x4cb   : > { %3901 = vpow2.f32 %v2167_v13 }
 0x4cc   : > { %3903 = vpow2.f32 %v2169_v62 }
 0x4ce   : > { %v2143_v44 = vpop.xlane.xlu0 %2142 }
 0x4cf   : > { %v2161_v43 = vsub.f32 %v1899_v14, %v2143_v44 }
 0x4d1   : > { %v2171_v63 = vmul.f32 1.442695, %v2161_v43 }
 0x4d2   : > { %v2146_v16 = vpop.xlane.xlu0 %2145 }
 0x4d3   : > { %3905 = vpow2.f32 %v2171_v63  ;;  %v2162_v38 = vsub.f32 %v1945_v15, %v2146_v16 }
 0x4d5   : > { %v2173_v18 = vmul.f32 1.442695, %v2162_v38 }
 0x4d6   : > { %v2149_v19 = vpop.xlane.xlu0 %2148  ;;  %v2152_v20 = vpop.xlane.xlu1 %2151 }
 0x4d7   : > { %3907 = vpow2.f32 %v2173_v18  ;;  %v2163_v21 = vsub.f32 %v1991_v30, %v2149_v19  ;;  %v2164_v45 = vsub.f32 %v2037_v51, %v2152_v20 }
 0x4d8   : > { %v4694_v22 = vpop.eup %3901 }
 0x4d9   : > { %v4696_v23 = vpop.eup %3903  ;;  %v2175_v24 = vmul.f32 1.442695, %v2163_v21  ;;  %v2177_v25 = vmul.f32 1.442695, %v2164_v45  ;;  %v2183_v26 = vsel %vm1766_vm3, %v4694_v22, 0.0 }
 0x4da   : > { %2184 = vadd.xlane.f32.xlu0 %v2183_v26  ;;  %v2186_v31 = vsel %vm1766_vm3, %v4696_v23, 0.0  ;;  %v1459_v36 = vpop.permute.xlu1 %1458 }
 0x4db   : > { %3909 = vpow2.f32 %v2175_v24  ;;  %2187 = vadd.xlane.f32.xlu1 %v2186_v31 }
 0x4dc   : > { %3911 = vpow2.f32 %v2177_v25 }
 0x4de   : > { %v2155_v37 = vpop.xlane.xlu0 %2154  ;;  %v1463_v40 = vpop.permute.xlu1 %1462 }
 0x4df   : > { %v2165_v39 = vsub.f32 %v4678_v57, %v2155_v37 }
 0x4e0   : > { %v4702_v8 = vpop.eup %3905 }
 0x4e1   : > { %v2189_v9 = vsel %vm1766_vm3, %v4702_v8, 0.0  ;;  %v2179_v27 = vmul.f32 1.442695, %v2165_v39 }
 0x4e2   : > { %2190 = vadd.xlane.f32.xlu0 %v2189_v9  ;;  %v1455_v28 = vpop.permute.xlu0 %1454 }
 0x4e3   : > { %3913 = vpow2.f32 %v2179_v27  ;;  %v1479_v51 = vcombine.high %v1455_v28, %v1463_v40 }
 0x4e4   : > { %v4706_v32 = vpop.eup %3907 }
 0x4e5   : > { %v2192_v33 = vsel %vm1766_vm3, %v4706_v32, 0.0  ;;  %v1493_v49 = vrot.slane %v1479_v51, %v4514_v58 }
 0x4e6   : > { %2193 = vadd.xlane.f32.xlu1 %v2192_v33 }
 0x4e8   : > { %v4710_v34 = vpop.eup %3909 }
 0x4e9   : > { %v2195_v14 = vsel %vm1766_vm3, %v4710_v34, 0.0  ;;  %v4714_v15 = vpop.eup %3911 }
 0x4ea   : > { %2196 = vadd.xlane.f32.xlu0 %v2195_v14  ;;  %v2198_v35 = vsel %vm1766_vm3, %v4714_v15, 0.0 }
 0x4ee   : > { %2199 = vadd.xlane.f32.xlu0 %v2198_v35 }
 0x4f0   : > { %v4736_v6 = vpop.eup %3913 }
 0x4f1   : > { %v2201_v16 = vsel %vm1766_vm3, %v4736_v6, 0.0 }
 0x4f7   : > { %1460 = vrot.lane.b32.xlu1 %v4503_v47, %s4141_s26  ;;  %v1478_v47 = vcombine.low %v1455_v28, %v1463_v40 }
 0x4fb   : > { %1464 = vrot.lane.b32.xlu1 %v4501_v46, %s4141_s26 }
 0x4ff   : > { %1468 = vrot.lane.b32.xlu1 %v4507_v48, %s4141_s26 }
 0x504   : > { %1456 = vrot.lane.b32.xlu0 %v4484_v41, %s4141_s26  ;;  %v1486_v41 = vrot.slane %v1478_v47, %v4514_v58 }
 0x50f   : > { %v2158_v29 = vpop.xlane.xlu1 %2157 }
 0x510   : > { %v2166_v30 = vsub.f32 %v4680_v59, %v2158_v29 }
 0x512   : > { %v2181_v46 = vmul.f32 1.442695, %v2166_v30 }
 0x513   : > { %v1467_v53 = vpop.permute.xlu1 %1466 }
 0x514   : > { %3915 = vpow2.f32 %v2181_v46  ;;  %v1494_v48 = vcombine.low %v1459_v36, %v1467_v53  ;;  %v1495_v42 = vcombine.high %v1459_v36, %v1467_v53 }
 0x516   : > { %v1502_v50 = vrot.slane %v1494_v48, %v4514_v58  ;;  %v1509_v52 = vrot.slane %v1495_v42, %v4514_v58 }
 0x518   : > { %v1510_v54 = vcombine.low %v1486_v41, %v1502_v50  ;;  %v1511_v55 = vcombine.high %v1486_v41, %v1502_v50  ;;  %v1526_v56 = vcombine.low %v1493_v49, %v1509_v52  ;;  %v1527_v57 = vcombine.high %v1493_v49, %v1509_v52 }
 0x51a   : > { %v1518_v59 = vrot.slane %v1510_v54, %v4524_v2  ;;  %v1525_v60 = vrot.slane %v1511_v55, %v4524_v2  ;;  %v1534_v61 = vrot.slane %v1526_v56, %v4524_v2  ;;  %v1541_v0 = vrot.slane %v1527_v57, %v4524_v2 }
 0x51c   : > { %v1614_v1 = vcombine.low %v1518_v59, %v1525_v60  ;;  %v3518_v3 = vcombine.high %v1518_v59, %v1525_v60  ;;  %v1630_v4 = vcombine.low %v1534_v61, %v1541_v0  ;;  %v3519_v5 = vcombine.high %v1534_v61, %v1541_v0 }
 0x51e   : > { %v1621_v7 = vrot.slane %v1614_v1, %v4514_v58  ;;  %v1629_v10 = vrot.slane %v3518_v3, %v4514_v58  ;;  %v1637_v11 = vrot.slane %v1630_v4, %v4514_v58  ;;  %v1645_v12 = vrot.slane %v3519_v5, %v4514_v58 }
 0x520   : > { %v1646_v13 = vcombine.low %v1621_v7, %v1629_v10  ;;  %v1662_v62 = vcombine.low %v1637_v11, %v1645_v12  ;;  %v1647_v44 = vcombine.high %v1621_v7, %v1629_v10  ;;  %v1663_v43 = vcombine.high %v1637_v11, %v1645_v12 }
 0x521   : > { %v4742_v63 = vpop.eup %3915 }
 0x522   : > { %v2204_v38 = vsel %vm1766_vm3, %v4742_v63, 0.0  ;;  %v1654_v18 = vrot.slane %v1646_v13, %v4524_v2  ;;  %v1670_v19 = vrot.slane %v1662_v62, %v4524_v2  ;;  %v1661_v20 = vrot.slane %v1647_v44, %v4524_v2 }
 0x523   : > { %2202 = vadd.xlane.f32.xlu0 %v2201_v16  ;;  %2205 = vadd.xlane.f32.xlu1 %v2204_v38  ;;  %v1677_v21 = vrot.slane %v1663_v43, %v4524_v2 }
 0x524   : > { %v1678_v45 = vcombine.low %v1654_v18, %v1670_v19  ;;  %v1679_v24 = vcombine.high %v1654_v18, %v1670_v19 }
 0x525   : > { %v1680_v25 = vcombine.low %v1661_v20, %v1677_v21  ;;  %v1681_v26 = vcombine.high %v1661_v20, %v1677_v21 }
 0x526   : > { %v2231_v31 = vpack.c.bf16 %v1678_v45, %v1678_v45  ;;  %v2232_v9 = vpack.c.bf16 %v1679_v24, %v1679_v24 }
 0x527   : > { %v2233_v29 = vpack.c.bf16 %v1680_v25, %v1680_v25  ;;  %v2234_v46 = vpack.c.bf16 %v1681_v26, %v1681_v26 }
 0x528   : > { %v2244_v33 = vsel %vm2242_vm4, %v2231_v31, 0  ;;  %v2290_v14 = vsel %vm2242_vm4, %v2232_v9, 0 }
 0x529   : > { %3675 = vmatpush3.bf16.msra.mxu1 %v2244_v33  ;;  %3681 = vmatpush3.bf16.msra.mxu0 %v2290_v14  ;;  %v2336_v42 = vsel %vm2242_vm4, %v2233_v29, 0  ;;  %v2382_v41 = vsel %vm2242_vm4, %v2234_v46, 0 }
 0x52a   : > { %3686 = vmatprep.subr.bf16.mxu1 %v4133_v17  ;;  %3692 = vmatprep.subr.bf16.mxu0 %v4133_v17 }
 0x563   : > { %v2185_v35 = vpop.xlane.xlu0 %2184 }
 0x564   : > { %3917 = vrcp.f32 %v2185_v35  ;;  %v2188_v36 = vpop.xlane.xlu1 %2187 }
 0x565   : > { %3919 = vrcp.f32 %v2188_v36 }
 0x56b   : > { %v2191_v37 = vpop.xlane.xlu0 %2190 }
 0x56c   : > { %3921 = vrcp.f32 %v2191_v37 }
 0x56f   : > { %v2194_v39 = vpop.xlane.xlu1 %2193 }
 0x570   : > { %3923 = vrcp.f32 %v2194_v39 }
 0x571   : > { %v3918_v40 = vpop.eup %3917 }
 0x572   : > { %v3920_v27 = vpop.eup %3919  ;;  %v2215_v28 = vmul.f32 %v3918_v40, %v4694_v22 }
 0x573   : > { %v2197_v30 = vpop.xlane.xlu0 %2196  ;;  %v1461_v47 = vpop.permute.xlu1 %1460  ;;  %v2216_v51 = vmul.f32 %v3920_v27, %v4696_v23 }
 0x574   : > { %v2223_v53 = vpack.c.bf16 %v2215_v28, %v2215_v28  ;;  %3925 = vrcp.f32 %v2197_v30 }
 0x575   : > { %v2224_v48 = vpack.c.bf16 %v2216_v51, %v2216_v51 }
 0x576   : > { %3677 = vmatmul.mubr.msk.bf16.vlgmr.msra.gmra.mxu1 %vm1766_vm3, %v2223_v53 }
 0x577   : > { %3683 = vmatmul.mubr.msk.bf16.vlgmr.msra.gmra.mxu0 %vm1766_vm3, %v2224_v48  ;;  %3687 = vmatpush3.bf16.msra.mxu1 %v2336_v42  ;;  %v2200_v49 = vpop.xlane.xlu0 %2199  ;;  %v1465_v50 = vpop.permute.xlu1 %1464 }
 0x578   : > { %3693 = vmatpush3.bf16.msra.mxu0 %v2382_v41  ;;  %3688 = vmatprep.mubr.msk.bf16.mxu1 %vm4134_vm2, %v4133_v17  ;;  %3927 = vrcp.f32 %v2200_v49 }
 0x579   : > { %v3922_v22 = vpop.eup %3921  ;;  %3694 = vmatprep.mubr.msk.bf16.mxu0 %vm4134_vm2, %v4133_v17  ;;  %3698 = vmatprep.subr.bf16.mxu1 %v4133_v17 }
 0x57a   : > { %v2217_v23 = vmul.f32 %v3922_v22, %v4702_v8  ;;  %3704 = vmatprep.subr.bf16.mxu0 %v4133_v17 }
 0x57b   : > { %v1457_v52 = vpop.permute.xlu0 %1456  ;;  %v1469_v54 = vpop.permute.xlu1 %1468 }
 0x57c   : > { %v1546_v55 = vcombine.low %v1457_v52, %v1465_v50  ;;  %v1547_v56 = vcombine.high %v1457_v52, %v1465_v50  ;;  %v1562_v57 = vcombine.low %v1461_v47, %v1469_v54  ;;  %v1563_v59 = vcombine.high %v1461_v47, %v1469_v54 }
 0x57d   : > { %v3924_v60 = vpop.eup %3923  ;;  %v2225_v61 = vpack.c.bf16 %v2217_v23, %v2217_v23 }
 0x57e   : > { %v1554_v0 = vrot.slane %v1546_v55, %v4514_v58  ;;  %v1561_v1 = vrot.slane %v1547_v56, %v4514_v58  ;;  %v1570_v3 = vrot.slane %v1562_v57, %v4514_v58  ;;  %v1577_v8 = vrot.slane %v1563_v59, %v4514_v58 }
 0x57f   : > { %3689 = vmatmul.mubr.msk.bf16.vlgmr.msra.gmra.mxu1 %vm1766_vm3, %v2225_v61  ;;  %v2218_v4 = vmul.f32 %v3924_v60, %v4706_v32 }
 0x580   : > { %v1578_v5 = vcombine.low %v1554_v0, %v1570_v3  ;;  %v1579_v7 = vcombine.high %v1554_v0, %v1570_v3  ;;  %v1594_v10 = vcombine.low %v1561_v1, %v1577_v8  ;;  %v1595_v11 = vcombine.high %v1561_v1, %v1577_v8  ;;  %3700 = vmatprep.mubr.msk.bf16.mxu1 %vm4134_vm2, %v4133_v17 }
 0x581   : > { %v2226_v12 = vpack.c.bf16 %v2218_v4, %v2218_v4  ;;  %v3926_v24 = vpop.eup %3925 }
 0x582   : > { %v1586_v13 = vrot.slane %v1578_v5, %v4524_v2  ;;  %v1593_v62 = vrot.slane %v1579_v7, %v4524_v2  ;;  %v1602_v44 = vrot.slane %v1594_v10, %v4524_v2  ;;  %v1609_v43 = vrot.slane %v1595_v11, %v4524_v2 }
 0x583   : > { %3695 = vmatmul.mubr.msk.bf16.vlgmr.msra.gmra.mxu0 %vm1766_vm3, %v2226_v12  ;;  %v2219_v47 = vmul.f32 %v3926_v24, %v4710_v34 }
 0x584   : > { %v1682_v16 = vcombine.low %v1586_v13, %v1593_v62  ;;  %v3520_v32 = vcombine.high %v1586_v13, %v1593_v62  ;;  %v1698_v38 = vcombine.low %v1602_v44, %v1609_v43  ;;  %v3521_v18 = vcombine.high %v1602_v44, %v1609_v43  ;;  %3706 = vmatprep.mubr.msk.bf16.mxu0 %vm4134_vm2, %v4133_v17 }
 0x585   : > { %v3928_v33 = vpop.eup %3927  ;;  %v2227_v41 = vpack.c.bf16 %v2219_v47, %v2219_v47 }
 0x586   : > { %v1689_v19 = vrot.slane %v1682_v16, %v4514_v58  ;;  %v1697_v20 = vrot.slane %v3520_v32, %v4514_v58  ;;  %v1705_v21 = vrot.slane %v1698_v38, %v4514_v58  ;;  %v1713_v45 = vrot.slane %v3521_v18, %v4514_v58 }
 0x587   : > { %v2220_v51 = vmul.f32 %v3928_v33, %v4714_v15 }
 0x588   : > { %v1714_v25 = vcombine.low %v1689_v19, %v1697_v20  ;;  %v1730_v26 = vcombine.low %v1705_v21, %v1713_v45  ;;  %v1715_v31 = vcombine.high %v1689_v19, %v1697_v20  ;;  %v1731_v9 = vcombine.high %v1705_v21, %v1713_v45 }
 0x589   : > { %v2228_v49 = vpack.c.bf16 %v2220_v51, %v2220_v51 }
 0x58a   : > { %v1722_v14 = vrot.slane %v1714_v25, %v4524_v2  ;;  %v1738_v35 = vrot.slane %v1730_v26, %v4524_v2  ;;  %v1729_v36 = vrot.slane %v1715_v31, %v4524_v2  ;;  %v1745_v37 = vrot.slane %v1731_v9, %v4524_v2 }
 0x58c   : > { %v1746_v39 = vcombine.low %v1722_v14, %v1738_v35  ;;  %v1747_v40 = vcombine.high %v1722_v14, %v1738_v35  ;;  %v1748_v27 = vcombine.low %v1729_v36, %v1745_v37  ;;  %v1749_v28 = vcombine.high %v1729_v36, %v1745_v37 }
 0x58e   : > { %v2235_v29 = vpack.c.bf16 %v1746_v39, %v1746_v39  ;;  %v2236_v30 = vpack.c.bf16 %v1747_v40, %v1747_v40  ;;  %v2237_v48 = vpack.c.bf16 %v1748_v27, %v1748_v27  ;;  %v2238_v42 = vpack.c.bf16 %v1749_v28, %v1749_v28 }
 0x590   : > { %v2428_v46 = vsel %vm2242_vm4, %v2235_v29, 0  ;;  %v2474_v53 = vsel %vm2242_vm4, %v2236_v30, 0  ;;  %v2520_v34 = vsel %vm2242_vm4, %v2237_v48, 0  ;;  %v2566_v15 = vsel %vm2242_vm4, %v2238_v42, 0 }
 0x591   : > { %3699 = vmatpush3.bf16.msra.mxu1 %v2428_v46  ;;  %3705 = vmatpush3.bf16.msra.mxu0 %v2474_v53 }
 0x592   : > { %3710 = vmatprep.subr.bf16.mxu1 %v4133_v17  ;;  %3716 = vmatprep.subr.bf16.mxu0 %v4133_v17 }
 0x594   : > { %3701 = vmatmul.mubr.msk.bf16.vlgmr.msra.gmra.mxu1 %vm1766_vm3, %v2227_v41  ;;  %3707 = vmatmul.mubr.msk.bf16.vlgmr.msra.gmra.mxu0 %vm1766_vm3, %v2228_v49 }
 0x595   : > { %3711 = vmatpush3.bf16.msra.mxu1 %v2520_v34  ;;  %3717 = vmatpush3.bf16.msra.mxu0 %v2566_v15 }
 0x596   : > { %3712 = vmatprep.mubr.msk.bf16.mxu1 %vm4134_vm2, %v4133_v17  ;;  %3718 = vmatprep.mubr.msk.bf16.mxu0 %vm4134_vm2, %v4133_v17 }
 0x597   : > { %3722 = vmatprep.subr.bf16.mxu1 %v4133_v17  ;;  %3730 = vmatprep.subr.bf16.mxu0 %v4133_v17 }
 0x5ac   : > { %v2203_v50 = vpop.xlane.xlu0 %2202  ;;  %v2206_v22 = vpop.xlane.xlu1 %2205 }
 0x5ad   : > { %3929 = vrcp.f32 %v2203_v50 }
 0x5ae   : > { %3931 = vrcp.f32 %v2206_v22 }
 0x5ba   : > { %v3930_v23 = vpop.eup %3929 }
 0x5bb   : > { %v3932_v52 = vpop.eup %3931  ;;  %v2221_v54 = vmul.f32 %v3930_v23, %v4736_v6 }
 0x5bc   : > { %v2222_v55 = vmul.f32 %v3932_v52, %v4742_v63 }
 0x5bd   : > { %v2229_v56 = vpack.c.bf16 %v2221_v54, %v2221_v54 }
 0x5be   : > { %v2230_v57 = vpack.c.bf16 %v2222_v55, %v2222_v55 }
 0x5bf   : > { %3713 = vmatmul.mubr.msk.bf16.vlgmr.msra.gmra.mxu1 %vm1766_vm3, %v2229_v56 }
 0x5c0   : > { %3719 = vmatmul.mubr.msk.bf16.vlgmr.msra.gmra.mxu0 %vm1766_vm3, %v2230_v57  ;;  %3726 = vmatprep.mubr.msk.bf16.mxu1 %vm4134_vm2, %v4133_v17 }
 0x5c1   : > { %3734 = vmatprep.mubr.msk.bf16.mxu0 %vm4134_vm2, %v4133_v17 }
 0x636   : > { %v2280_v59 = vpop.f32.mrf.mxu1 }
 0x637   : > { %v2326_v60 = vpop.f32.mrf.mxu0 }
 0x638   : > { %v3678_v61 = vpop.f32.mrf.mxu1 }
 0x639   : > { %v3684_v0 = vpop.f32.mrf.mxu0 }
 0x63a   : > { %v2283_v1 = vpop.f32.mrf.mxu1 }
 0x63b   : > { %v2329_v6 = vpop.f32.mrf.mxu0 }
 0x63c   : > { %v3679_v3 = vpop.f32.mrf.mxu1 }
 0x63d   : > { %v3685_v63 = vpop.f32.mrf.mxu0 }
 0x63f   : > { %v2372_v8 = vpop.f32.mrf.mxu1 }
 0x640   : > { %v2608_v4 = vcombine.low %v2280_v59, %v2372_v8  ;;  %v2609_v5 = vcombine.high %v2280_v59, %v2372_v8 }
 0x641   : > { %v3690_v7 = vpop.f32.mrf.mxu1 }
 0x642   : > { %v2616_v43 = vrot.slane %v2608_v4, %v4514_v58  ;;  %v2623_v16 = vrot.slane %v2609_v5, %v4514_v58 }
 0x643   : > { %v2375_v10 = vpop.f32.mrf.mxu1  ;;  %v2418_v11 = vpop.f32.mrf.mxu0 }
 0x644   : > { %v2624_v12 = vcombine.low %v2326_v60, %v2418_v11  ;;  %v2625_v13 = vcombine.high %v2326_v60, %v2418_v11 }
 0x645   : > { %v3691_v62 = vpop.f32.mrf.mxu1  ;;  %v3696_v44 = vpop.f32.mrf.mxu0 }
 0x646   : > { %v2632_v32 = vrot.slane %v2624_v12, %v4514_v58  ;;  %v2639_v38 = vrot.slane %v2625_v13, %v4514_v58 }
 0x647   : > { %v2421_v18 = vpop.f32.mrf.mxu0 }
 0x648   : > { %v2640_v19 = vcombine.low %v2616_v43, %v2632_v32  ;;  %v2641_v20 = vcombine.high %v2616_v43, %v2632_v32  ;;  %v2656_v21 = vcombine.low %v2623_v16, %v2639_v38  ;;  %v2657_v45 = vcombine.high %v2623_v16, %v2639_v38 }
 0x649   : > { %v3697_v24 = vpop.f32.mrf.mxu0 }
 0x64a   : > { %v2648_v25 = vrot.slane %v2640_v19, %v4524_v2  ;;  %v2655_v26 = vrot.slane %v2641_v20, %v4524_v2  ;;  %v2664_v31 = vrot.slane %v2656_v21, %v4524_v2  ;;  %v2671_v9 = vrot.slane %v2657_v45, %v4524_v2  ;;  %v3889_v24 = vld [vmem:[%s4416_s19 + $0x8] sm:$0xff]  }
 0x64b   : > { %3723 = vmatpush3.bf16.msra.mxu1 %v3889_v24 }
 0x64c   : > { %v2744_v33 = vcombine.low %v2648_v25, %v2655_v26  ;;  %v3538_v14 = vcombine.high %v2648_v25, %v2655_v26  ;;  %v2760_v35 = vcombine.low %v2664_v31, %v2671_v9  ;;  %v3539_v36 = vcombine.high %v2664_v31, %v2671_v9  ;;  %3724 = vmatprep.subr.bf16.mxu1 %v4133_v17 }
 0x64e   : > { %v2751_v37 = vrot.slane %v2744_v33, %v4514_v58  ;;  %v2759_v39 = vrot.slane %v3538_v14, %v4514_v58  ;;  %v2767_v40 = vrot.slane %v2760_v35, %v4514_v58  ;;  %v2775_v27 = vrot.slane %v3539_v36, %v4514_v58 }
 0x650   : > { %v2777_v28 = vcombine.high %v2751_v37, %v2759_v39  ;;  %v2793_v29 = vcombine.high %v2767_v40, %v2775_v27  ;;  %v2776_v30 = vcombine.low %v2751_v37, %v2759_v39  ;;  %v2792_v47 = vcombine.low %v2767_v40, %v2775_v27  ;;  %v3890_v37 = vld [vmem:[%s4416_s19] sm:$0xff]   ;;  %s4143_s19 = smov 8  }
 0x651   : > { %3725 = vmatpush3.bf16.msra.mxu1 %v3890_v37 }
 0x652   : > { %v4829_v51 = vrot.slane %v2777_v28, %v4524_v2  ;;  %v4832_v46 = vrot.slane %v2793_v29, %v4524_v2  ;;  %v4835_v53 = vrot.slane %v2776_v30, %v4524_v2  ;;  %v4838_v48 = vrot.slane %v2792_v47, %v4524_v2  ;;  %3738 = vmatprep.subr.bf16.mxu1 %v4133_v17 }
 0x654   : > { %v2464_v42 = vpop.f32.mrf.mxu1  ;;  %v2510_v41 = vpop.f32.mrf.mxu0  ;;  %v2810_v49 = vcombine.low %v4829_v51, %v4832_v46  ;;  %v2808_v34 = vcombine.low %v4835_v53, %v4838_v48  ;;  %v2809_v15 = vcombine.high %v4835_v53, %v4838_v48  ;;  %v2811_v50 = vcombine.high %v4829_v51, %v4832_v46  ;;  %v3542_v53 = vld [vmem:[%s5102_s23] ss:$0 sm:$0xff] }
 0x656   : > { %v3702_v22 = vpop.f32.mrf.mxu1  ;;  %v3708_v23 = vpop.f32.mrf.mxu0 }
 0x658   : > { %v2467_v52 = vpop.f32.mrf.mxu1  ;;  %v2513_v54 = vpop.f32.mrf.mxu0 }
 0x65a   : > { %v3703_v55 = vpop.f32.mrf.mxu1  ;;  %v3709_v56 = vpop.f32.mrf.mxu0 }
 0x67f   : > { %v2556_v57 = vpop.f32.mrf.mxu1 }
 0x680   : > { %v2676_v59 = vcombine.low %v2464_v42, %v2556_v57  ;;  %v2677_v60 = vcombine.high %v2464_v42, %v2556_v57  ;;  %v2602_v61 = vpop.f32.mrf.mxu0 }
 0x681   : > { %v2692_v0 = vcombine.low %v2510_v41, %v2602_v61  ;;  %v2693_v1 = vcombine.high %v2510_v41, %v2602_v61  ;;  %v3714_v6 = vpop.f32.mrf.mxu1 }
 0x682   : > { %v2684_v3 = vrot.slane %v2676_v59, %v4514_v58  ;;  %v2691_v63 = vrot.slane %v2677_v60, %v4514_v58  ;;  %v3720_v8 = vpop.f32.mrf.mxu0  ;;  %v3941_v6 = vld [vmem:[%s4444_s20] sm:$0xff] }
 0x683   : > { %v2700_v4 = vrot.slane %v2692_v0, %v4514_v58  ;;  %v2707_v5 = vrot.slane %v2693_v1, %v4514_v58  ;;  %v2559_v7 = vpop.f32.mrf.mxu1 }
 0x684   : > { %v2605_v10 = vpop.f32.mrf.mxu0  ;;  %v3942_v7 = vld [vmem:[%s4444_s20 + $0x8] sm:$0xff] }
 0x685   : > { %v2708_v11 = vcombine.low %v2684_v3, %v2700_v4  ;;  %v2709_v12 = vcombine.high %v2684_v3, %v2700_v4  ;;  %v2724_v13 = vcombine.low %v2691_v63, %v2707_v5  ;;  %v2725_v62 = vcombine.high %v2691_v63, %v2707_v5  ;;  %v3715_v44 = vpop.f32.mrf.mxu1 }
 0x686   : > { %v3721_v43 = vpop.f32.mrf.mxu0 }
 0x687   : > { %v2716_v16 = vrot.slane %v2708_v11, %v4524_v2  ;;  %v2723_v32 = vrot.slane %v2709_v12, %v4524_v2  ;;  %v2732_v38 = vrot.slane %v2724_v13, %v4524_v2  ;;  %v2739_v18 = vrot.slane %v2725_v62, %v4524_v2 }
 0x689   : > { %v2812_v19 = vcombine.low %v2716_v16, %v2723_v32  ;;  %v3540_v20 = vcombine.high %v2716_v16, %v2723_v32  ;;  %v2828_v21 = vcombine.low %v2732_v38, %v2739_v18  ;;  %v3541_v45 = vcombine.high %v2732_v38, %v2739_v18 }
 0x68b   : > { %v2819_v25 = vrot.slane %v2812_v19, %v4514_v58  ;;  %v2827_v26 = vrot.slane %v3540_v20, %v4514_v58  ;;  %v2835_v31 = vrot.slane %v2828_v21, %v4514_v58  ;;  %v2843_v9 = vrot.slane %v3541_v45, %v4514_v58  ;;  %v3891_v20 = vld [vmem:[%s5103_s0 + $0x8] sm:$0xff]   ;;  %v3892_v21 = vld [vmem:[%s5103_s0] sm:$0xff]  }
 0x68c   : > { %3731 = vmatpush3.bf16.msra.mxu0 %v3891_v20 }
 0x68d   : > { %v2845_v33 = vcombine.high %v2819_v25, %v2827_v26  ;;  %v2861_v14 = vcombine.high %v2835_v31, %v2843_v9  ;;  %v2844_v35 = vcombine.low %v2819_v25, %v2827_v26  ;;  %v2860_v36 = vcombine.low %v2835_v31, %v2843_v9  ;;  %3732 = vmatprep.subr.bf16.mxu0 %v4133_v17 }
 0x68f   : > { %v2859_v39 = vrot.slane %v2845_v33, %v4524_v2  ;;  %v2875_v40 = vrot.slane %v2861_v14, %v4524_v2  ;;  %v2852_v27 = vrot.slane %v2844_v35, %v4524_v2  ;;  %v2868_v28 = vrot.slane %v2860_v36, %v4524_v2  ;;  %v3546_v35 = vld [vmem:[%s724_s29] ss:$0 sm:$0xff] }
 0x690   : > { %3733 = vmatpush3.bf16.msra.mxu0 %v3892_v21 }
 0x691   : > { %v2878_v58 = vcombine.low %v2859_v39, %v2875_v40  ;;  %v2877_v29 = vcombine.high %v2852_v27, %v2868_v28  ;;  %v2876_v30 = vcombine.low %v2852_v27, %v2868_v28  ;;  %v2879_v41 = vcombine.high %v2859_v39, %v2875_v40  ;;  %v3547_v40 = vld [vmem:[%s727_s11] ss:$0 sm:$0xff] }
 0x693   : > { %v3877_v47 = vpack.i.bf16 %v2878_v58, %v2810_v49  ;;  %v3872_v42 = vpack.i.bf16 %v2877_v29, %v2809_v15  ;;  %v3882_v22 = vpack.i.bf16 %v2879_v41, %v2811_v50  ;;  %v3896_v41 = vld [vmem:[%s4442_s14] sm:$0xff]  }
 0x695   : > { %3878 = vrot.lane.b32.xlu1 %v3877_v47, %s4142_s28  ;;  %3873 = vrot.lane.b32.xlu0 %v3872_v42, %s4143_s19  ;;  %v3894_v47 = vld [vmem:[%s4442_s14 + $0x10] sm:$0xff]   ;;  %v3895_v42 = vld [vmem:[%s4442_s14 + $0x8] sm:$0xff]  }
 0x699   : > { %3883 = vrot.lane.b32.xlu0 %v3882_v22, %s4144_s18  ;;  %v3548_v22 = vld [vmem:[%s730_s3] ss:$0 sm:$0xff] }
 0x707   : > { %v3879_v2 = vpop.permute.xlu1 %3878  ;;  %v3874_v23 = vpop.permute.xlu0 %3873 }
 0x708   : > { %v3876_v52 = vunpack.i.h.bf16 %v3874_v23  ;;  %v3875_v54 = vunpack.i.l.bf16 %v3874_v23  ;;  %v3881_v55 = vunpack.i.h.bf16 %v3879_v2  ;;  %v3880_v49 = vunpack.i.l.bf16 %v3879_v2 }
 0x70a   : > { %v2904_v15 = vsel %vm1766_vm3, %v2808_v34, %v3875_v54  ;;  %v2905_v56 = vsel %vm1766_vm3, %v2876_v30, %v3876_v52  ;;  %v3893_v30 = vld [vmem:[%s4442_s14 + $0x18] sm:$0xff]  }
 0x70b   : > { %v3884_v51 = vpop.permute.xlu0 %3883  ;;  %v2907_v57 = vsel %vm2906_vm5, %v2904_v15, %v3880_v49  ;;  %v2908_v59 = vsel %vm2906_vm5, %v2905_v56, %v3881_v55 }
 0x70c   : > { %v3886_v46 = vunpack.i.h.bf16 %v3884_v51  ;;  %v3885_v50 = vunpack.i.l.bf16 %v3884_v51 }
 0x70e   : > { %v2910_v60 = vsel %vm2909_vm6, %v2907_v57, %v3885_v50  ;;  %v2911_v61 = vsel %vm2909_vm6, %v2908_v59, %v3886_v46 }
 0x70f   : > { %v2912_v0 = vpack.c.bf16 %v2911_v61, %v2910_v60 }
 0x711   : > { %3727 = vmatmul.mubr.msk.bf16.vlgmr.msra.gmra.mxu1 %vm754_vm1, %v2912_v0 }
 0x712   : > { %3746 = vmatprep.mubr.msk.bf16.mxu1 %vm4134_vm2, %v4133_v17  ;;  %3739 = vmatpush3.bf16.msra.mxu1 %v3893_v30 }
 0x713   : > { %3740 = vmatprep.subr.bf16.mxu1 %v4133_v17 }
 0x716   : > { %3741 = vmatpush3.bf16.msra.mxu1 %v3894_v47 }
 0x717   : > { %3742 = vmatprep.subr.bf16.mxu1 %v4133_v17 }
 0x71a   : > { %3743 = vmatpush3.bf16.msra.mxu1 %v3895_v42 }
 0x71b   : > { %3744 = vmatprep.subr.bf16.mxu1 %v4133_v17 }
 0x71e   : > { %3745 = vmatpush3.bf16.msra.mxu1 %v3896_v41 }
 0x7d1   : > { %v2973_v48 = vpop.f32.mrf.mxu1 }
 0x7d2   : > { %v2974_v34 = vadd.f32 %v3542_v53, %v2973_v48 }
 0x7d3   : > { %v3728_v1 = vpop.f32.mrf.mxu1 }
 0x7d4   : > { %v4886_v3 = vadd.f32 %v3941_v6, %v2974_v34 }
 0x7d5   : > { %v2976_v63 = vpop.f32.mrf.mxu1 }
 0x7d6   : > { %v2977_v8 = vadd.f32 %v3542_v53, %v2976_v63  ;;  %v2984_v4 = vsel %vm754_vm1, %v4886_v3, 0.0 }
 0x7d7   : > { %2985 = vadd.xlane.f32.xlu1 %v2984_v4  ;;  %v3729_v5 = vpop.f32.mrf.mxu1 }
 0x7d8   : > { %v4891_v10 = vadd.f32 %v3942_v7, %v2977_v8  ;;  %v3552_v5 = vld [vmem:[%s738_s5] ss:$0 sm:$0xff] }
 0x7da   : > { %v2987_v11 = vsel %vm754_vm1, %v4891_v10, 0.0 }
 0x7db   : > { %2988 = vadd.xlane.f32.xlu0 %v2987_v11 }
 0x860   : > { %v2986_v12 = vpop.xlane.xlu1 %2985 }
 0x861   : > { %v2990_v13 = vmul.f32 0.03125, %v2986_v12 }
 0x863   : > { %v2992_v62 = vsub.f32 %v4886_v3, %v2990_v13 }
 0x864   : > { %v2989_v44 = vpop.xlane.xlu0 %2988 }
 0x865   : > { %v2991_v43 = vmul.f32 0.03125, %v2989_v44  ;;  %v2994_v16 = vmul.f32 %v2992_v62, %v2992_v62 }
 0x867   : > { %v2993_v32 = vsub.f32 %v4891_v10, %v2991_v43  ;;  %v2996_v38 = vsel %vm754_vm1, %v2994_v16, 0.0 }
 0x868   : > { %2997 = vadd.xlane.f32.xlu0 %v2996_v38 }
 0x869   : > { %v2995_v18 = vmul.f32 %v2993_v32, %v2993_v32 }
 0x86b   : > { %v2999_v19 = vsel %vm754_vm1, %v2995_v18, 0.0 }
 0x86c   : > { %3000 = vadd.xlane.f32.xlu0 %v2999_v19 }
 0x8f1   : > { %v2998_v45 = vpop.xlane.xlu0 %2997 }
 0x8f2   : > { %v3002_v24 = vmul.f32 0.03125, %v2998_v45 }
 0x8f4   : > { %v3004_v25 = vadd.f32 1e-05, %v3002_v24 }
 0x8f5   : > { %v3001_v26 = vpop.xlane.xlu0 %3000 }
 0x8f6   : > { %3933 = vrsqrt.f32 %v3004_v25  ;;  %v3003_v31 = vmul.f32 0.03125, %v3001_v26 }
 0x8f8   : > { %v3005_v9 = vadd.f32 1e-05, %v3003_v31 }
 0x8fa   : > { %3935 = vrsqrt.f32 %v3005_v9 }
 0x903   : > { %v3934_v33 = vpop.eup %3933 }
 0x904   : > { %v3008_v14 = vmul.f32 %v3934_v33, %v2992_v62 }
 0x906   : > { %v3016_v39 = vmul.f32 %v3546_v35, %v3008_v14 }
 0x907   : > { %v3936_v36 = vpop.eup %3935 }
 0x908   : > { %v3009_v37 = vmul.f32 %v3936_v36, %v2993_v32  ;;  %v3024_v28 = vadd.f32 %v3547_v40, %v3016_v39 }
 0x90a   : > { %v3017_v27 = vmul.f32 %v3546_v35, %v3009_v37 }
 0x90c   : > { %v3025_v58 = vadd.f32 %v3547_v40, %v3017_v27 }
 0x90e   : > { %v3026_v29 = vpack.c.bf16 %v3025_v58, %v3024_v28 }
 0x910   : > { %3735 = vmatmul.mubr.msk.bf16.vlgmr.msra.gmra.mxu0 %vm754_vm1, %v3026_v29 }
 0x9d0   : > { %v3087_v2 = vpop.f32.mrf.mxu0 }
 0x9d1   : > { %v3088_v23 = vadd.f32 %v3548_v22, %v3087_v2 }
 0x9d2   : > { %v3736_v52 = vpop.f32.mrf.mxu0 }
 0x9d3   : > { %v3096_v54 = vmul.f32 0.044715, %v3088_v23  ;;  %v3094_v34 = vmul.f32 0.5, %v3088_v23 }
 0x9d4   : > { %v3090_v55 = vpop.f32.mrf.mxu0 }
 0x9d5   : > { %v3098_v49 = vmul.f32 %v3096_v54, %v3088_v23  ;;  %v3091_v15 = vadd.f32 %v3548_v22, %v3090_v55 }
 0x9d6   : > { %v3737_v56 = vpop.f32.mrf.mxu0 }
 0x9d7   : > { %v3100_v51 = vmul.f32 %v3098_v49, %v3088_v23  ;;  %v3097_v46 = vmul.f32 0.044715, %v3091_v15  ;;  %v3095_v1 = vmul.f32 0.5, %v3091_v15 }
 0x9d9   : > { %v3102_v50 = vadd.f32 %v3100_v51, %v3088_v23  ;;  %v3099_v57 = vmul.f32 %v3097_v46, %v3091_v15 }
 0x9db   : > { %v3104_v59 = vmul.f32 0.7978846, %v3102_v50  ;;  %v3101_v17 = vmul.f32 %v3099_v57, %v3091_v15 }
 0x9dd   : > { %3937 = vtanh.f32 %v3104_v59  ;;  %v3103_v60 = vadd.f32 %v3101_v17, %v3091_v15 }
 0x9df   : > { %v3105_v61 = vmul.f32 0.7978846, %v3103_v60 }
 0x9e1   : > { %3939 = vtanh.f32 %v3105_v61 }
 0x9ea   : > { %v3938_v0 = vpop.eup %3937 }
 0x9eb   : > { %v3108_v53 = vadd.f32 1.0, %v3938_v0 }
 0x9ed   : > { %v3110_v63 = vmul.f32 %v3108_v53, %v3094_v34 }
 0x9ee   : > { %v3940_v48 = vpop.eup %3939 }
 0x9ef   : > { %v3109_v6 = vadd.f32 1.0, %v3940_v48 }
 0x9f1   : > { %v3111_v8 = vmul.f32 %v3109_v6, %v3095_v1 }
 0x9f3   : > { %v3112_v4 = vpack.c.bf16 %v3111_v8, %v3110_v63 }
 0x9f5   : > { %3747 = vmatmul.mubr.msk.bf16.vlgmr.msra.gmra.mxu1 %vm3152_vm7, %v3112_v4 }
 0xab5   : > { %v3190_v7 = vpop.f32.mrf.mxu1 }
 0xab6   : > { %v3191_v11 = vadd.f32 %v3552_v5, %v3190_v7 }
 0xab7   : > { %v3748_v12 = vpop.f32.mrf.mxu1 }
 0xab8   : > { %v3197_v13 = vadd.f32 %v3191_v11, %v4886_v3  ;;  %3202 = sbr.rel (%p3558_p1) target bundleno = 2751 (0xabf), region = 96 }
 0xab9   : > { %v3193_v62 = vpop.f32.mrf.mxu1 }
 0xaba   : > { %v3194_v44 = vadd.f32 %v3552_v5, %v3193_v62 }
 0xabb   : > { %v3749_v43 = vpop.f32.mrf.mxu1 }
 0xabc   : > { %v3198_v16 = vadd.f32 %v3194_v44, %v4891_v10 }
 0xabd   : > { %3203 = vst.msk [vmem:[%s4444_s20] sm:$0xff] %vm754_vm1, %v3197_v13 }
 0xabe   : > { %3204 = vst.msk [vmem:[%s4444_s20 + $0x8] sm:$0xff] %vm754_vm1, %v3198_v16 }
 0xabf PF: > { %p3559_p9 = scmp.ne.s32.totalorder %s4111_s24, 1 }
 0xac0   : > { %s5106_s13 = sld [smem:[#allocation35_spill]] (!%p3559_p9) }
 0xac1   : > { %3208 = sbr.rel (%p3559_p9) target bundleno = 3071 (0xbff), region = 100  ;;  %s5107_s21 = sld [smem:[#allocation36_spill]] (!%p3559_p9) }
 0xac6   : > { %v3211_v3 = vsel %vm754_vm1, %v3197_v13, 0.0  ;;  %v3214_v32 = vsel %vm754_vm1, %v3198_v16, 0.0  ;;  %v3560_v39 = vld [vmem:[%s5106_s13] ss:$0 sm:$0xff] }
 0xac7   : > { %3212 = vadd.xlane.f32.xlu0 %v3211_v3  ;;  %v3561_v27 = vld [vmem:[%s5107_s21] ss:$0 sm:$0xff] }
 0xacb   : > { %3215 = vadd.xlane.f32.xlu0 %v3214_v32 }
 0xb50   : > { %v3213_v10 = vpop.xlane.xlu0 %3212 }
 0xb51   : > { %v3217_v38 = vmul.f32 0.03125, %v3213_v10 }
 0xb53   : > { %v3219_v18 = vsub.f32 %v3197_v13, %v3217_v38 }
 0xb54   : > { %v3216_v19 = vpop.xlane.xlu0 %3215 }
 0xb55   : > { %v3218_v20 = vmul.f32 0.03125, %v3216_v19  ;;  %v3221_v21 = vmul.f32 %v3219_v18, %v3219_v18 }
 0xb57   : > { %v3220_v45 = vsub.f32 %v3198_v16, %v3218_v20  ;;  %v3223_v24 = vsel %vm754_vm1, %v3221_v21, 0.0 }
 0xb58   : > { %3224 = vadd.xlane.f32.xlu1 %v3223_v24 }
 0xb59   : > { %v3222_v25 = vmul.f32 %v3220_v45, %v3220_v45 }
 0xb5b   : > { %v3226_v26 = vsel %vm754_vm1, %v3222_v25, 0.0 }
 0xb5c   : > { %3227 = vadd.xlane.f32.xlu1 %v3226_v26 }
 0xbe1   : > { %v3225_v31 = vpop.xlane.xlu1 %3224 }
 0xbe2   : > { %v3229_v9 = vmul.f32 0.03125, %v3225_v31 }
 0xbe4   : > { %v3231_v33 = vadd.f32 1e-05, %v3229_v9 }
 0xbe5   : > { %v3228_v14 = vpop.xlane.xlu1 %3227 }
 0xbe6   : > { %3943 = vrsqrt.f32 %v3231_v33  ;;  %v3230_v35 = vmul.f32 0.03125, %v3228_v14 }
 0xbe8   : > { %v3232_v36 = vadd.f32 1e-05, %v3230_v35 }
 0xbea   : > { %3945 = vrsqrt.f32 %v3232_v36 }
 0xbf3   : > { %v3944_v37 = vpop.eup %3943 }
 0xbf4   : > { %v3235_v40 = vmul.f32 %v3944_v37, %v3219_v18 }
 0xbf6   : > { %v3243_v28 = vmul.f32 %v3560_v39, %v3235_v40 }
 0xbf7   : > { %v3946_v58 = vpop.eup %3945 }
 0xbf8   : > { %v3251_v29 = vadd.f32 %v3561_v27, %v3243_v28  ;;  %v3236_v30 = vmul.f32 %v3946_v58, %v3220_v45 }
 0xbfa   : > { %3253 = vst.msk [vmem:[%s4444_s20] sm:$0xff] %vm754_vm1, %v3251_v29  ;;  %v3244_v47 = vmul.f32 %v3560_v39, %v3236_v30 }
 0xbfc   : > { %v3252_v42 = vadd.f32 %v3561_v27, %v3244_v47 }
 0xbfe   : > { %3254 = vst.msk [vmem:[%s4444_s20 + $0x8] sm:$0xff] %vm754_vm1, %v3252_v42 }
 0xbff PF: > { %s5108_s9 = sld [smem:[#allocation16_spill]]  ;;  %s3269_s25 = sshll.u32 %s4444_s20, 4  ;;  %s4959_s25 = int_to_ptr.vmem [resolvable:$true] %s3269_s25 }
 0xc00   : > { %s5109_s26 = sld [smem:[#allocation12_spill]]  ;;  %s4003_s11 = scalar_lea.vmem %s4959_s25, 256 }
 0xc01   : > { %s5111_s23 = sld [smem:[#allocation37_spill]]  ;;  %p4004_p10 = scmp.ne.s32.totalorder %s4959_s25, %s4003_s11 }
 0xc02   : > { %s4145_s29 = smov [#allocation7]  }
 0xc03   : > { %p4005_p11 = pnand %p4004_p10, %p4315_p12  ;;  %s4007_s15 = sshll.u32 %s4145_s29, 4  ;;  %s4008_s15 = int_to_ptr.vmem [resolvable:$false] %s4007_s15 }
 0xc04   : > { %s4009_s3 = scalar_lea.vmem %s4008_s15, 512  ;;  %p4010_p5 = scmp.lt.s32.totalorder %s4959_s25, %s4008_s15 }
 0xc05   : > { %s3571_s18 = sshll.u32 %s5108_s9, 8  ;;  %p4006_p3 = pneg %p4005_p11 }
 0xc06   : > { %s5113_s12 = sand.u32 1, %s5109_s26   ;;  %p4011_p6 = scmp.lt.s32.totalorder %s4009_s3, %s4003_s11 }
 0xc07   : > { %s5112_s0 = smov %s5111_s23  ;;  %s4956_s22 = scalar_lea.hbm %s5111_s23, %s3571_s18 }
 0xc08   : > { %s4963_s27 = scalar_lea.sflag [#allocation4], %s5113_s12  ;;  %p4012_p13 = por %p4011_p6, %p4010_p5 }
 0xc0a   : > { %p4013_p0 = pnand %p4012_p13, %p4006_p3 }
 0xc0c   : > { %4016 = shalt.err (!%p4013_p0)
}
 0xc0d   : > { %s4017_s20 = scalar_lea.hbm %s4956_s22, 256  ;;  %s4021_s5 = scalar_lea.hbm %s5112_s0, 512 }
 0xc0e   : > { %p4018_p4 = scmp.ne.s32.totalorder %s4956_s22, %s4017_s20  ;;  %p4022_p1 = scmp.lt.s32.totalorder %s4956_s22, %s5112_s0 }
 0xc0f   : > { %p4023_p9 = scmp.lt.s32.totalorder %s4021_s5, %s4017_s20 }
 0xc10   : > { %p4019_p7 = pnand %p4018_p4, %p4315_p12 }
 0xc11   : > { %p4024_p10 = por %p4023_p9, %p4022_p1 }
 0xc12   : > { %p4020_p8 = pneg %p4019_p7 }
 0xc14   : > { %p4025_p11 = pnand %p4024_p10, %p4020_p8 }
 0xc16   : > { %4028 = shalt.err (!%p4025_p11)
}
 0xc17   : > { %s4146_s1 = smov 128  }
 0xc18   : > { %3754 = dma.vmem_to_hbm [thread:$0]  (%p4315_p12), %s4959_s25, 256, %s4956_s22, %s4963_s27, %s4146_s1, %s4146_s1, %s4143_s19  }
 0xc19 PF: > { %s5114_s30 = sld [smem:[#allocation19_spill]] }
 0xc1a   : > { %s5115_s21 = sld [smem:[#allocation11_spill]] }
 0xc1f   : > { %p3768_p3 = scmp.ge.s32.totalorder %s5114_s30, 2 }
 0xc20   : > { %s3284_s26 = sand.u32 1, %s5115_s21  }
 0xc21   : > { %p3764_p5 = pnand %p3768_p3, %p4325_p2  ;;  %s3285_s18 = scalar_lea.sflag [#allocation4], %s3284_s26 }
 0xc23   : > { %p3765_p6 = pneg %p3764_p5 }
 0xc25   : > { %4082 = dma.done.wait (%p3765_p6), %s3285_s18, 256  }
 0xc26   : > { %4084 = vsyncadd (%p3765_p6), %s3285_s18, 4294967040  ;;  %s34_s28 = sadd.s32 1, %s5114_s30   ;;  %s5117_s18 = sld [smem:[#allocation12_spill]] }
 0xc27   : > { %p31_p13 = scmp.ge.s32.totalorder %s34_s28, 6   ;;  %s5118_s19 = sld [smem:[#allocation13_spill]] }
 0xc28   : > { %s5119_s20 = sld [smem:[#allocation23_spill]] }
 0xc29   : > { %s5120_s21 = sld [smem:[#allocation14_spill]] }
 0xc2a   : > { %s5121_s22 = sld [smem:[#allocation15_spill]] }
 0xc2b   : > { %s5122_s23 = sld [smem:[#allocation22_spill]]  ;;  %33 = sbr.rel (!%p31_p13) target bundleno = 23 (0x17), region = 183 }
 0xc2c   : > { %s5123_s24 = sld [smem:[#allocation17_spill]] }
 0xc2d   : > { %s5124_s25 = sld [smem:[#allocation18_spill]] }
 0xc2e   : > { %s5125_s26 = sld [smem:[#allocation20_spill]] }
 0xc2f   : > { %s5126_s27 = sld [smem:[#allocation21_spill]] }
 0xc30   :  { %3290 = vsyncpa [#allocation3], 1 }
 0xc31   :  { %3292 = vsyncpa [#allocation3 + $0x1], 1 }
 0xc32   :  { %3293 = vsyncpa [#allocation6], 1 }
 0xc33   :  { %3295 = vsyncpa [#allocation6 + $0x1], 1 }
 0xc34   :  { %3296 = vsyncpa [#allocation4], 1 }
 0xc35   :  { %3298 = vsyncpa [#allocation4 + $0x1], 1 }

</bundles_post_ra>
